<compile_context>
chip_gen: v7x
topology: tpu7x:2x2x1
jax: 0.10.0
libtpu: 0.0.40
codegen_flags: <defaults>
</compile_context>

<pallas_src>
import math
import functools

import jax
import jax.numpy as jnp
from jax.experimental import pallas as pl
from jax.experimental.pallas import tpu as pltpu


# ----------------------------- shared math helpers -----------------------------

def _layernorm(v, w, b, eps=1e-5):
    """LayerNorm over the last axis (biased variance), matches torch.nn.LayerNorm."""
    mu = jnp.mean(v, axis=-1, keepdims=True)
    var = jnp.mean(jnp.square(v - mu), axis=-1, keepdims=True)
    return (v - mu) * jax.lax.rsqrt(var + eps) * w + b


def _recip(x, approx):
    """1/x; rides the (otherwise idle) EUP slot when approx=True. Guarded for older jax."""
    fn = getattr(pl, "reciprocal", None)
    if approx and fn is not None:
        return fn(x, approx=True)
    return 1.0 / x


def _erf(z, approx_recip=False):
    # Abramowitz & Stegun 7.1.26 polynomial (|error| < 1.5e-7).  Used instead of lax.erf
    # so the kernel never depends on an erf primitive lowering inside Mosaic.
    a1, a2, a3, a4, a5 = 0.254829592, -0.284496736, 1.421413741, -1.453152027, 1.061405429
    p = 0.3275911
    az = jnp.abs(z)
    t = _recip(1.0 + p * az, approx_recip)
    poly = t * (a1 + t * (a2 + t * (a3 + t * (a4 + t * a5))))
    e = 1.0 - poly * jnp.exp(-az * az)
    return jnp.where(z < 0.0, -e, e)


def _gelu(z, approx_recip=False):
    # Exact (erf-based) GELU, matching torch.nn.GELU() default, via the polynomial above.
    return 0.5 * z * (1.0 + _erf(z * (1.0 / math.sqrt(2.0)), approx_recip))


def _tpu_memory_plan():
    """Generation-aware (vmem_limit_bytes, default q tile, default token tile)."""
    cap = None
    try:
        fn = getattr(pltpu, "get_tpu_info", None)
        if fn is not None:
            cap = getattr(fn(), "vmem_capacity_bytes", None)
    except Exception:  # pragma: no cover - defensive: fall back to smallest VMEM
        cap = None
    if not cap:
        cap = 64 * 1024 * 1024                      # assume v7x-class (smallest) VMEM
    if cap >= 100 * 1024 * 1024:                    # v5e / v6e: 128 MiB per core
        return 96 * 1024 * 1024, 256, 512
    return 48 * 1024 * 1024, 128, 256               # v7x: 64 MiB per core


# --------------------------------- kernels --------------------------------------

def _graph_attention_kernel(x_full_ref, x_q_ref, adj_ref, ln1w_ref, ln1b_ref,
                            wq_ref, wkv_ref, wg_ref, bg_ref, wp_ref, bp_ref,
                            y_ref, *, use_exp, approx_recip):
    """grid=(batch, q_tile): y = GraphAttention(norm1(x), adj)[q rows] + norm1(x)[q rows]."""
    f32 = jnp.float32
    N, C = x_full_ref.shape[1], x_full_ref.shape[2]
    HC = wq_ref.shape[1]
    H = HC // C
    cd = wq_ref.dtype                      # MXU input dtype (bf16 production / f32 check)
    scale = C ** -0.5

    ln_w = ln1w_ref[...]
    ln_b = ln1b_ref[...]
    xn_full = _layernorm(x_full_ref[0].astype(f32), ln_w, ln_b)   # (N, C): keys / values
    xn_q = _layernorm(x_q_ref[0].astype(f32), ln_w, ln_b)         # (tq, C): queries / residual

    # Fused lane-dense projections: one (tq,C)@(C,H*C) and one (N,C)@(C,2*H*C) matmul
    # instead of 3*H narrow (C,C) matmuls.
    q = jnp.dot(xn_q.astype(cd), wq_ref[...], preferred_element_type=f32).astype(cd)
    kv = jnp.dot(xn_full.astype(cd), wkv_ref[...], preferred_element_type=f32).astype(cd)

    # gamma gate (width-2 projection, kept in f32; tiny either way).
    g = jnp.dot(xn_q, wg_ref[...], preferred_element_type=f32) + bg_ref[...]
    if use_exp:
        g = jnp.exp(g)
    g0 = g[:, 0:1]                         # weight on dot-product attention
    g1 = g[:, 1:2]                         # weight on the adjacency matrix

    adj_t = adj_ref[0].astype(f32)         # (tq, N)

    # Per-head attention from static lane-slices of the fused projections (scores in f32).
    # TODO(synk): for very large N switch to lax.fori_loop over heads + flash-style KV
    #             tiling with online softmax to bound the (tq, N) live scores.
    heads = []
    for h in range(H):
        qh = q[:, h * C:(h + 1) * C]                     # (tq, C)
        kh = kv[:, h * C:(h + 1) * C]                    # (N,  C)
        vh = kv[:, HC + h * C: HC + (h + 1) * C]         # (N,  C)
        s = jax.lax.dot_general(qh, kh, (((1,), (1,)), ((), ())),
                                preferred_element_type=f32) * scale     # (tq, N)
        s = g0 * s + g1 * adj_t                          # fused_mul_add
        s = s - jnp.max(s, axis=-1, keepdims=True)       # stable softmax
        e = jnp.exp(s)
        attn_p = e * _recip(jnp.sum(e, axis=-1, keepdims=True), approx_recip)
        heads.append(jnp.dot(attn_p.astype(cd), vh, preferred_element_type=f32))

    # Concatenated heads -> single wide (tq, H*C) @ (H*C, C) out-projection.
    o = jnp.concatenate(heads, axis=-1).astype(cd)
    y = jnp.dot(o, wp_ref[...], preferred_element_type=f32) + bp_ref[...] + xn_q
    y_ref[...] = y[None].astype(y_ref.dtype)


def _mlp_adapter_kernel(y_ref, x_ref, ln2w_ref, ln2b_ref,
                        w1_ref, b1_ref, w2_ref, b2_ref,
                        wd_ref, bd_ref, wu_ref, bu_ref, scale_ref, o_ref,
                        *, approx_recip):
    """Token-tiled: out = (mlp(norm2(y)) + norm2(y)) + adapter(original x)."""
    f32 = jnp.float32
    cd = w1_ref.dtype

    z = _layernorm(y_ref[...].astype(f32), ln2w_ref[...], ln2b_ref[...])        # norm2

    h = jnp.dot(z.astype(cd), w1_ref[...], preferred_element_type=f32) + b1_ref[...]
    h = _gelu(h, approx_recip)                                                  # f32 GELU (v5e-safe)
    m = jnp.dot(h.astype(cd), w2_ref[...], preferred_element_type=f32) + b2_ref[...] + z

    # Adapter on the ORIGINAL block input (lst_x in the PyTorch forward).
    d = jnp.dot(x_ref[...], wd_ref[...], preferred_element_type=f32) + bd_ref[...]
    d = jnp.maximum(d, 0.0)                                                     # ReLU
    # TODO(synk): dropout(p=0.0) is the identity; non-zero p would need pltpu.prng_* masking.
    a = jnp.dot(d.astype(cd), wu_ref[...], preferred_element_type=f32) + bu_ref[...]
    a = a * scale_ref[0]                                                        # learned scalar (SMEM)

    o_ref[...] = (m + a).astype(o_ref.dtype)


# --------------------------------- wrapper ---------------------------------------

@functools.partial(jax.jit, static_argnames=("num_heads", "use_exp", "compute_dtype",
                                             "tq", "tm", "approx_recip"))
def attention_block_forward(x, adj, params, *, num_heads, use_exp=True,
                            compute_dtype=jnp.bfloat16, tq=None, tm=None,
                            approx_recip=True):
    """x: (B, N, C), adj: (B, N, N) -> (B, N, C) in `compute_dtype` (AttentionBlock.forward)."""
    B, N, C = x.shape
    H = num_heads
    HC = H * C
    p = params
    cd = compute_dtype
    f32 = jnp.float32

    vmem_limit, tq_def, tm_def = _tpu_memory_plan()
    tq_cap = tq if tq is not None else tq_def
    tm_cap = tm if tm is not None else tm_def
    tq_eff = N if N <= tq_cap else tq_cap            # full dim when small, else 8-aligned tile
    T = B * N
    tm_eff = T if T <= tm_cap else tm_cap

    # Small vectors stay f32 (elementwise path); large matrices go to the compute dtype.
    ln1w = p["ln1_w"].reshape(1, C).astype(f32); ln1b = p["ln1_b"].reshape(1, C).astype(f32)
    ln2w = p["ln2_w"].reshape(1, C).astype(f32); ln2b = p["ln2_b"].reshape(1, C).astype(f32)
    wq_f = p["wqkv"][:, :HC].astype(cd)              # (C, H*C)   fused query projection
    wkv_f = p["wqkv"][:, HC:].astype(cd)             # (C, 2*H*C) fused key|value projection
    wg = p["wg"].astype(f32); bg = p["bg"].reshape(1, 2).astype(f32)
    wp = p["wp"].astype(cd); bp = p["bp"].reshape(1, C).astype(f32)
    w1 = p["w1"].astype(cd); b1 = p["b1"].reshape(1, -1).astype(f32)
    w2 = p["w2"].astype(cd); b2 = p["b2"].reshape(1, C).astype(f32)
    wd = p["wd"].astype(cd); bd = p["bd"].reshape(1, -1).astype(f32)
    wu = p["wu"].astype(cd); bu = p["bu"].reshape(1, C).astype(f32)
    scale = p["adapter_scale"].astype(f32)
    HD = w1.shape[1]
    DS = wd.shape[1]

    xc = x.astype(cd)
    adjc = adj.astype(cd)

    const2 = lambda b, qi: (0, 0)
    n_q = pl.cdiv(N, tq_eff)

    # --- Kernel A: norm1 + GraphAttention + residual (grid over batch x query tiles) ---
    y = pl.pallas_call(
        functools.partial(_graph_attention_kernel, use_exp=use_exp,
                          approx_recip=approx_recip),
        out_shape=jax.ShapeDtypeStruct((B, N, C), cd),
        grid=(B, n_q),
        in_specs=[
            pl.BlockSpec((1, N, C), lambda b, qi: (b, 0, 0)),         # x, all rows (K/V source)
            pl.BlockSpec((1, tq_eff, C), lambda b, qi: (b, qi, 0)),   # x, query-row tile
            pl.BlockSpec((1, tq_eff, N), lambda b, qi: (b, qi, 0)),   # adj rows for this q tile
            pl.BlockSpec((1, C), const2),                             # ln1 weight
            pl.BlockSpec((1, C), const2),                             # ln1 bias
            pl.BlockSpec((C, HC), const2),                            # fused Wq  (all heads)
            pl.BlockSpec((C, 2 * HC), const2),                        # fused Wkv (all heads)
            pl.BlockSpec((C, 2), const2),                             # predict_gamma weight
            pl.BlockSpec((1, 2), const2),                             # predict_gamma bias
            pl.BlockSpec((HC, C), const2),                            # fused out-projection
            pl.BlockSpec((1, C), const2),                             # out-projection bias
        ],
        out_specs=pl.BlockSpec((1, tq_eff, C), lambda b, qi: (b, qi, 0)),
        compiler_params=pltpu.CompilerParams(
            dimension_semantics=("parallel", "parallel"),
            vmem_limit_bytes=vmem_limit),
    )(xc, xc, adjc, ln1w, ln1b, wq_f, wkv_f, wg, bg, wp, bp)

    # --- Kernel B: norm2 + MLP + residual + adapter(original x) + final residual ---
    y2 = y.reshape(T, C)
    x2 = xc.reshape(T, C)
    tok = lambda i: (i, 0)
    const1 = lambda i: (0, 0)

    out = pl.pallas_call(
        functools.partial(_mlp_adapter_kernel, approx_recip=approx_recip),
        out_shape=jax.ShapeDtypeStruct((T, C), cd),
        grid=(pl.cdiv(T, tm_eff),),
        in_specs=[
            pl.BlockSpec((tm_eff, C), tok),                           # attention sub-block output
            pl.BlockSpec((tm_eff, C), tok),                           # original x (adapter input)
            pl.BlockSpec((1, C), const1),                             # ln2 weight
            pl.BlockSpec((1, C), const1),                             # ln2 bias
            pl.BlockSpec((C, HD), const1),                            # mlp W1
            pl.BlockSpec((1, HD), const1),                            # mlp b1
            pl.BlockSpec((HD, C), const1),                            # mlp W2
            pl.BlockSpec((1, C), const1),                             # mlp b2
            pl.BlockSpec((C, DS), const1),                            # adapter down W
            pl.BlockSpec((1, DS), const1),                            # adapter down b
            pl.BlockSpec((DS, C), const1),                            # adapter up W
            pl.BlockSpec((1, C), const1),                             # adapter up b
            pl.BlockSpec(memory_space=pltpu.MemorySpace.SMEM),        # adapter scale (scalar)
        ],
        out_specs=pl.BlockSpec((tm_eff, C), tok),
        compiler_params=pltpu.CompilerParams(
            dimension_semantics=("parallel",), vmem_limit_bytes=vmem_limit),
    )(y2, x2, ln2w, ln2b, w1, b1, w2, b2, wd, bd, wu, bu, scale)

    return out.reshape(B, N, C)


# ------------------------------ params & reference -------------------------------

def init_pt_params(key, dim, num_heads, mlp_ratio=4, down_size=64):
    """Random parameters in PyTorch (out_features, in_features) layout.

    NOTE: the real module zero-inits the adapter's up_proj and both adapter biases;
    random values are used here so the adapter path is actually exercised
    (initialization does not change the forward semantics being tested).
    """
    C, H, HD = dim, num_heads, dim * mlp_ratio
    ks = list(jax.random.split(key, 8))

    def linear(k, out_f, in_f, bias=True, low=None, high=None):
        bound = 1.0 / math.sqrt(in_f)
        kw, kb = jax.random.split(k)
        if low is None:
            w = jax.random.uniform(kw, (out_f, in_f), jnp.float32, -bound, bound)
        else:
            w = jax.random.uniform(kw, (out_f, in_f), jnp.float32, low, high)
        b = jax.random.uniform(kb, (out_f,), jnp.float32, -bound, bound) if bias else None
        return w, b

    qkv_w, _ = linear(ks[0], 3 * H * C, C, bias=False)             # qkv_projection (bias=False)
    proj_w, proj_b = linear(ks[1], C, H * C)                        # proj
    gamma_w, gamma_b = linear(ks[2], 2, C, low=0.0, high=0.01)      # predict_gamma weight ~ U(0, 0.01)
    mlp_w1, mlp_b1 = linear(ks[3], HD, C)
    mlp_w2, mlp_b2 = linear(ks[4], C, HD)
    down_w, down_b = linear(ks[5], down_size, C)                    # adapter down_proj
    up_w, up_b = linear(ks[6], C, down_size)                        # adapter up_proj
    return dict(
        ln1_w=jnp.ones((C,), jnp.float32), ln1_b=jnp.zeros((C,), jnp.float32),
        ln2_w=jnp.ones((C,), jnp.float32), ln2_b=jnp.zeros((C,), jnp.float32),
        qkv_w=qkv_w, proj_w=proj_w, proj_b=proj_b,
        gamma_w=gamma_w, gamma_b=gamma_b,
        mlp_w1=mlp_w1, mlp_b1=mlp_b1, mlp_w2=mlp_w2, mlp_b2=mlp_b2,
        adpt_down_w=down_w, adpt_down_b=down_b,
        adpt_up_w=up_w, adpt_up_b=up_b,
        adpt_scale=jnp.ones((1,), jnp.float32),
    )


def to_kernel_params(pt, num_heads):
    """PyTorch (out, in) weights -> fused (in, out) layouts used by the kernels."""
    del num_heads  # layout is already head-contiguous in the transposed weights
    return dict(
        ln1_w=pt["ln1_w"], ln1_b=pt["ln1_b"], ln2_w=pt["ln2_w"], ln2_b=pt["ln2_b"],
        # qkv out-feature index = ((t*H)+h)*C + d, so the transpose's columns are already
        # ordered [Q(h0..h{H-1}) | K(...) | V(...)], each head contiguous over C.
        wqkv=pt["qkv_w"].T,                 # (C, 3*H*C)
        wg=pt["gamma_w"].T, bg=pt["gamma_b"],
        wp=pt["proj_w"].T,                  # (H*C, C), input feature index = h*C + d
        bp=pt["proj_b"],
        w1=pt["mlp_w1"].T, b1=pt["mlp_b1"],
        w2=pt["mlp_w2"].T, b2=pt["mlp_b2"],
        wd=pt["adpt_down_w"].T, bd=pt["adpt_down_b"],
        wu=pt["adpt_up_w"].T, bu=pt["adpt_up_b"],
        adapter_scale=pt["adpt_scale"],
    )


def attention_block_reference(x, adj, p, *, num_heads, use_exp=True):
    """Pure-JAX f32 reference mirroring the PyTorch AttentionBlock.forward."""
    hi = jax.lax.Precision.HIGHEST
    B, N, C = x.shape
    H = num_heads

    xn = _layernorm(x, p["ln1_w"], p["ln1_b"])                                  # norm1
    qkv = jnp.einsum("bnc,cf->bnf", xn, p["wqkv"], precision=hi).reshape(B, N, 3, H, C)
    q, k, v = qkv[:, :, 0], qkv[:, :, 1], qkv[:, :, 2]                          # (B, N, H, C)
    s = jnp.einsum("bnhc,bmhc->bhnm", q, k, precision=hi) * (C ** -0.5)
    g = jnp.einsum("bnc,cg->bng", xn, p["wg"], precision=hi) + p["bg"]
    if use_exp:
        g = jnp.exp(g)
    s = g[:, None, :, 0:1] * s + g[:, None, :, 1:2] * adj[:, None]
    s = jax.nn.softmax(s, axis=-1)
    o = jnp.einsum("bhnm,bmhc->bnhc", s, v, precision=hi).reshape(B, N, H * C)
    y = jnp.einsum("bnf,fc->bnc", o, p["wp"], precision=hi) + p["bp"] + xn      # + residual

    z = _layernorm(y, p["ln2_w"], p["ln2_b"])                                   # norm2
    m = _gelu(jnp.einsum("bnc,ch->bnh", z, p["w1"], precision=hi) + p["b1"])
    m = jnp.einsum("bnh,hc->bnc", m, p["w2"], precision=hi) + p["b2"] + z       # MLP + residual

    d = jnp.maximum(jnp.einsum("bnc,cd->bnd", x, p["wd"], precision=hi) + p["bd"], 0.0)
    a = (jnp.einsum("bnd,dc->bnc", d, p["wu"], precision=hi) + p["bu"]) * p["adapter_scale"][0]
    return m + a


# ----------------------------------- test -----------------------------------------

if __name__ == "__main__":
    key = jax.random.PRNGKey(0)
    k_x, k_adj, k_p = jax.random.split(key, 3)

    B, N, dim, num_heads = 2, 16, 32, 4
    x = jax.random.normal(k_x, (B, N, dim), dtype=jnp.float32)
    adj = jax.random.uniform(k_adj, (B, N, N), dtype=jnp.float32)   # dense (soft) adjacency

    pt = init_pt_params(k_p, dim, num_heads)
    params = to_kernel_params(pt, num_heads)

    ref = attention_block_reference(x, adj, params, num_heads=num_heads, use_exp=True)

    # 1) f32 path with exact divides: tight validation of the fused-kernel math.
    out32 = attention_block_forward(x, adj, params, num_heads=num_heads, use_exp=True,
                                    compute_dtype=jnp.float32, approx_recip=False)
    out32 = jax.block_until_ready(out32)
    assert out32.shape == x.shape
    err32 = float(jnp.max(jnp.abs(out32.astype(jnp.float32) - ref)))
    assert err32 < 2e-3, f"f32 kernel mismatch vs JAX reference (max abs err {err32})"

    # 2) bf16 production path (native MXU input dtype, half HBM/VMEM) + EUP approx recip:
    #    bf16-class accuracy, validated with a correspondingly loose tolerance.
    outbf = attention_block_forward(x, adj, params, num_heads=num_heads, use_exp=True,
                                    compute_dtype=jnp.bfloat16, approx_recip=True)
    outbf = jax.block_until_ready(outbf)
    assert outbf.shape == x.shape
    errbf = float(jnp.max(jnp.abs(outbf.astype(jnp.float32) - ref)))
    assert errbf < 1.5e-1, f"bf16 kernel mismatch vs JAX reference (max abs err {errbf})"

    print("KERNEL_OK")
</pallas_src>

<mosaic_0001>
module attributes {stable_mosaic.version = 11 : i64} {
  func.func @_graph_attention_kernel(%arg0: i32, %arg1: i32, %arg2: memref<1x16x32xf32, #tpu.memory_space<vmem>>, %arg3: memref<1x16x32xf32, #tpu.memory_space<vmem>>, %arg4: memref<1x16x16xf32, #tpu.memory_space<vmem>>, %arg5: memref<1x32xf32, #tpu.memory_space<vmem>>, %arg6: memref<1x32xf32, #tpu.memory_space<vmem>>, %arg7: memref<32x128xf32, #tpu.memory_space<vmem>>, %arg8: memref<32x256xf32, #tpu.memory_space<vmem>>, %arg9: memref<32x2xf32, #tpu.memory_space<vmem>>, %arg10: memref<1x2xf32, #tpu.memory_space<vmem>>, %arg11: memref<128x32xf32, #tpu.memory_space<vmem>>, %arg12: memref<1x32xf32, #tpu.memory_space<vmem>>, %arg13: memref<1x16x32xf32, #tpu.memory_space<vmem>>) attributes {dimension_semantics = [#tpu.dimension_semantics<parallel>, #tpu.dimension_semantics<parallel>], iteration_bounds = array<i64: 2, 1>, scalar_prefetch = 0 : i64, scratch_operands = 0 : i64, tpu.core_type = #tpu.core_type<tc>, window_params = [{transform_indices = @transform_0, window_bounds = array<i64: 1, 16, 32>}, {transform_indices = @transform_1, window_bounds = array<i64: 1, 16, 32>}, {transform_indices = @transform_2, window_bounds = array<i64: 1, 16, 16>}, {pipeline_mode = #tpu.pipeline_mode<synchronous>, transform_indices = @transform_3, window_bounds = array<i64: 1, 32>}, {pipeline_mode = #tpu.pipeline_mode<synchronous>, transform_indices = @transform_4, window_bounds = array<i64: 1, 32>}, {pipeline_mode = #tpu.pipeline_mode<synchronous>, transform_indices = @transform_5, window_bounds = array<i64: 32, 128>}, {pipeline_mode = #tpu.pipeline_mode<synchronous>, transform_indices = @transform_6, window_bounds = array<i64: 32, 256>}, {pipeline_mode = #tpu.pipeline_mode<synchronous>, transform_indices = @transform_7, window_bounds = array<i64: 32, 2>}, {pipeline_mode = #tpu.pipeline_mode<synchronous>, transform_indices = @transform_8, window_bounds = array<i64: 1, 2>}, {pipeline_mode = #tpu.pipeline_mode<synchronous>, transform_indices = @transform_9, window_bounds = array<i64: 128, 32>}, {pipeline_mode = #tpu.pipeline_mode<synchronous>, transform_indices = @transform_10, window_bounds = array<i64: 1, 32>}, {transform_indices = @transform_11, window_bounds = array<i64: 1, 16, 32>}]} {
    %c0 = arith.constant 0 : index
    %c0_0 = arith.constant 0 : index
    %0 = vector.load %arg5[%c0, %c0_0] : memref<1x32xf32, #tpu.memory_space<vmem>>, vector<1x32xf32>
    %c0_1 = arith.constant 0 : index
    %c0_2 = arith.constant 0 : index
    %1 = vector.load %arg6[%c0_1, %c0_2] : memref<1x32xf32, #tpu.memory_space<vmem>>, vector<1x32xf32>
    %c0_3 = arith.constant 0 : index
    %c0_4 = arith.constant 0 : index
    %c0_5 = arith.constant 0 : index
    %2 = vector.load %arg2[%c0_3, %c0_4, %c0_5] : memref<1x16x32xf32, #tpu.memory_space<vmem>>, vector<1x16x32xf32>
    %3 = vector.shape_cast %2 : vector<1x16x32xf32> to vector<16x32xf32>
    %cst = arith.constant dense<0.000000e+00> : vector<16xf32>
    %4 = vector.multi_reduction <add>, %3, %cst [1] : vector<16x32xf32> to vector<16xf32>
    %5 = vector.shape_cast %4 : vector<16xf32> to vector<16x1xf32>
    %cst_6 = arith.constant 3.200000e+01 : f32
    %6 = vector.broadcast %cst_6 : f32 to vector<16x1xf32>
    %7 = arith.divf %5, %6 : vector<16x1xf32>
    %8 = vector.broadcast %7 : vector<16x1xf32> to vector<16x32xf32>
    %9 = arith.subf %3, %8 : vector<16x32xf32>
    %10 = arith.mulf %9, %9 : vector<16x32xf32>
    %cst_7 = arith.constant dense<0.000000e+00> : vector<16xf32>
    %11 = vector.multi_reduction <add>, %10, %cst_7 [1] : vector<16x32xf32> to vector<16xf32>
    %12 = vector.shape_cast %11 : vector<16xf32> to vector<16x1xf32>
    %cst_8 = arith.constant 3.200000e+01 : f32
    %13 = vector.broadcast %cst_8 : f32 to vector<16x1xf32>
    %14 = arith.divf %12, %13 : vector<16x1xf32>
    %15 = vector.broadcast %7 : vector<16x1xf32> to vector<16x32xf32>
    %16 = arith.subf %3, %15 : vector<16x32xf32>
    %cst_9 = arith.constant 9.99999974E-6 : f32
    %17 = vector.broadcast %cst_9 : f32 to vector<16x1xf32>
    %18 = arith.addf %14, %17 : vector<16x1xf32>
    %19 = math.rsqrt %18 : vector<16x1xf32>
    %20 = vector.broadcast %19 : vector<16x1xf32> to vector<16x32xf32>
    %21 = arith.mulf %16, %20 : vector<16x32xf32>
    %22 = vector.broadcast %0 : vector<1x32xf32> to vector<16x32xf32>
    %23 = arith.mulf %21, %22 : vector<16x32xf32>
    %24 = vector.broadcast %1 : vector<1x32xf32> to vector<16x32xf32>
    %25 = arith.addf %23, %24 : vector<16x32xf32>
    %c0_10 = arith.constant 0 : index
    %c0_11 = arith.constant 0 : index
    %c0_12 = arith.constant 0 : index
    %26 = vector.load %arg3[%c0_10, %c0_11, %c0_12] : memref<1x16x32xf32, #tpu.memory_space<vmem>>, vector<1x16x32xf32>
    %27 = vector.shape_cast %26 : vector<1x16x32xf32> to vector<16x32xf32>
    %cst_13 = arith.constant dense<0.000000e+00> : vector<16xf32>
    %28 = vector.multi_reduction <add>, %27, %cst_13 [1] : vector<16x32xf32> to vector<16xf32>
    %29 = vector.shape_cast %28 : vector<16xf32> to vector<16x1xf32>
    %cst_14 = arith.constant 3.200000e+01 : f32
    %30 = vector.broadcast %cst_14 : f32 to vector<16x1xf32>
    %31 = arith.divf %29, %30 : vector<16x1xf32>
    %32 = vector.broadcast %31 : vector<16x1xf32> to vector<16x32xf32>
    %33 = arith.subf %27, %32 : vector<16x32xf32>
    %34 = arith.mulf %33, %33 : vector<16x32xf32>
    %cst_15 = arith.constant dense<0.000000e+00> : vector<16xf32>
    %35 = vector.multi_reduction <add>, %34, %cst_15 [1] : vector<16x32xf32> to vector<16xf32>
    %36 = vector.shape_cast %35 : vector<16xf32> to vector<16x1xf32>
    %cst_16 = arith.constant 3.200000e+01 : f32
    %37 = vector.broadcast %cst_16 : f32 to vector<16x1xf32>
    %38 = arith.divf %36, %37 : vector<16x1xf32>
    %39 = vector.broadcast %31 : vector<16x1xf32> to vector<16x32xf32>
    %40 = arith.subf %27, %39 : vector<16x32xf32>
    %cst_17 = arith.constant 9.99999974E-6 : f32
    %41 = vector.broadcast %cst_17 : f32 to vector<16x1xf32>
    %42 = arith.addf %38, %41 : vector<16x1xf32>
    %43 = math.rsqrt %42 : vector<16x1xf32>
    %44 = vector.broadcast %43 : vector<16x1xf32> to vector<16x32xf32>
    %45 = arith.mulf %40, %44 : vector<16x32xf32>
    %46 = vector.broadcast %0 : vector<1x32xf32> to vector<16x32xf32>
    %47 = arith.mulf %45, %46 : vector<16x32xf32>
    %48 = vector.broadcast %1 : vector<1x32xf32> to vector<16x32xf32>
    %49 = arith.addf %47, %48 : vector<16x32xf32>
    %c0_18 = arith.constant 0 : index
    %c0_19 = arith.constant 0 : index
    %50 = vector.load %arg7[%c0_18, %c0_19] : memref<32x128xf32, #tpu.memory_space<vmem>>, vector<32x128xf32>
    %cst_20 = arith.constant dense<0.000000e+00> : vector<16x128xf32>
    %51 = tpu.matmul %49, %50, %cst_20 {dimension_numbers = #tpu.dot_dimension_numbers<[1], [0], [0], [1], [0, 0, 1, 1], [], []>} : vector<16x32xf32>, vector<32x128xf32>, vector<16x128xf32> -> vector<16x128xf32>
    %c0_21 = arith.constant 0 : index
    %c0_22 = arith.constant 0 : index
    %52 = vector.load %arg8[%c0_21, %c0_22] : memref<32x256xf32, #tpu.memory_space<vmem>>, vector<32x256xf32>
    %cst_23 = arith.constant dense<0.000000e+00> : vector<16x256xf32>
    %53 = tpu.matmul %25, %52, %cst_23 {dimension_numbers = #tpu.dot_dimension_numbers<[1], [0], [0], [1], [0, 0, 1, 1], [], []>} : vector<16x32xf32>, vector<32x256xf32>, vector<16x256xf32> -> vector<16x256xf32>
    %c0_24 = arith.constant 0 : index
    %c0_25 = arith.constant 0 : index
    %54 = vector.load %arg9[%c0_24, %c0_25] : memref<32x2xf32, #tpu.memory_space<vmem>>, vector<32x2xf32>
    %cst_26 = arith.constant dense<0.000000e+00> : vector<16x2xf32>
    %55 = tpu.matmul %49, %54, %cst_26 {dimension_numbers = #tpu.dot_dimension_numbers<[1], [0], [0], [1], [0, 0, 1, 1], [], []>} : vector<16x32xf32>, vector<32x2xf32>, vector<16x2xf32> -> vector<16x2xf32>
    %c0_27 = arith.constant 0 : index
    %c0_28 = arith.constant 0 : index
    %56 = vector.load %arg10[%c0_27, %c0_28] : memref<1x2xf32, #tpu.memory_space<vmem>>, vector<1x2xf32>
    %57 = vector.broadcast %56 : vector<1x2xf32> to vector<16x2xf32>
    %58 = arith.addf %55, %57 : vector<16x2xf32>
    %59 = math.exp %58 : vector<16x2xf32>
    %60 = vector.extract_strided_slice %59 {offsets = [0, 0], sizes = [16, 1], strides = [1, 1]} : vector<16x2xf32> to vector<16x1xf32>
    %61 = vector.extract_strided_slice %59 {offsets = [0, 1], sizes = [16, 1], strides = [1, 1]} : vector<16x2xf32> to vector<16x1xf32>
    %c0_29 = arith.constant 0 : index
    %c0_30 = arith.constant 0 : index
    %c0_31 = arith.constant 0 : index
    %62 = vector.load %arg4[%c0_29, %c0_30, %c0_31] : memref<1x16x16xf32, #tpu.memory_space<vmem>>, vector<1x16x16xf32>
    %63 = vector.shape_cast %62 : vector<1x16x16xf32> to vector<16x16xf32>
    %64 = vector.extract_strided_slice %51 {offsets = [0, 0], sizes = [16, 32], strides = [1, 1]} : vector<16x128xf32> to vector<16x32xf32>
    %65 = vector.extract_strided_slice %53 {offsets = [0, 0], sizes = [16, 32], strides = [1, 1]} : vector<16x256xf32> to vector<16x32xf32>
    %66 = vector.extract_strided_slice %53 {offsets = [0, 128], sizes = [16, 32], strides = [1, 1]} : vector<16x256xf32> to vector<16x32xf32>
    %cst_32 = arith.constant dense<0.000000e+00> : vector<16x16xf32>
    %67 = tpu.matmul %64, %65, %cst_32 {dimension_numbers = #tpu.dot_dimension_numbers<[1], [1], [0], [0], [0, 0, 1, 0], [], []>} : vector<16x32xf32>, vector<16x32xf32>, vector<16x16xf32> -> vector<16x16xf32>
    %cst_33 = arith.constant 0.176776692 : f32
    %68 = vector.broadcast %cst_33 : f32 to vector<16x16xf32>
    %69 = arith.mulf %67, %68 : vector<16x16xf32>
    %70 = vector.broadcast %60 : vector<16x1xf32> to vector<16x16xf32>
    %71 = arith.mulf %70, %69 : vector<16x16xf32>
    %72 = vector.broadcast %61 : vector<16x1xf32> to vector<16x16xf32>
    %73 = arith.mulf %72, %63 : vector<16x16xf32>
    %74 = arith.addf %71, %73 : vector<16x16xf32>
    %cst_34 = arith.constant dense<0xFF800000> : vector<16xf32>
    %75 = vector.multi_reduction <maximumf>, %74, %cst_34 [1] : vector<16x16xf32> to vector<16xf32>
    %76 = vector.shape_cast %75 : vector<16xf32> to vector<16x1xf32>
    %77 = vector.broadcast %76 : vector<16x1xf32> to vector<16x16xf32>
    %78 = arith.subf %74, %77 : vector<16x16xf32>
    %79 = math.exp %78 : vector<16x16xf32>
    %cst_35 = arith.constant dense<0.000000e+00> : vector<16xf32>
    %80 = vector.multi_reduction <add>, %79, %cst_35 [1] : vector<16x16xf32> to vector<16xf32>
    %81 = vector.shape_cast %80 : vector<16xf32> to vector<16x1xf32>
    %cst_36 = arith.constant 1.000000e+00 : f32
    %82 = vector.broadcast %cst_36 : f32 to vector<16x1xf32>
    %83 = arith.divf %82, %81 : vector<16x1xf32>
    %84 = vector.broadcast %83 : vector<16x1xf32> to vector<16x16xf32>
    %85 = arith.mulf %79, %84 : vector<16x16xf32>
    %cst_37 = arith.constant dense<0.000000e+00> : vector<16x32xf32>
    %86 = tpu.matmul %85, %66, %cst_37 {dimension_numbers = #tpu.dot_dimension_numbers<[1], [0], [0], [1], [0, 0, 1, 1], [], []>} : vector<16x16xf32>, vector<16x32xf32>, vector<16x32xf32> -> vector<16x32xf32>
    %87 = vector.extract_strided_slice %51 {offsets = [0, 32], sizes = [16, 32], strides = [1, 1]} : vector<16x128xf32> to vector<16x32xf32>
    %88 = vector.extract_strided_slice %53 {offsets = [0, 32], sizes = [16, 32], strides = [1, 1]} : vector<16x256xf32> to vector<16x32xf32>
    %89 = vector.extract_strided_slice %53 {offsets = [0, 160], sizes = [16, 32], strides = [1, 1]} : vector<16x256xf32> to vector<16x32xf32>
    %cst_38 = arith.constant dense<0.000000e+00> : vector<16x16xf32>
    %90 = tpu.matmul %87, %88, %cst_38 {dimension_numbers = #tpu.dot_dimension_numbers<[1], [1], [0], [0], [0, 0, 1, 0], [], []>} : vector<16x32xf32>, vector<16x32xf32>, vector<16x16xf32> -> vector<16x16xf32>
    %cst_39 = arith.constant 0.176776692 : f32
    %91 = vector.broadcast %cst_39 : f32 to vector<16x16xf32>
    %92 = arith.mulf %90, %91 : vector<16x16xf32>
    %93 = vector.broadcast %60 : vector<16x1xf32> to vector<16x16xf32>
    %94 = arith.mulf %93, %92 : vector<16x16xf32>
    %95 = vector.broadcast %61 : vector<16x1xf32> to vector<16x16xf32>
    %96 = arith.mulf %95, %63 : vector<16x16xf32>
    %97 = arith.addf %94, %96 : vector<16x16xf32>
    %cst_40 = arith.constant dense<0xFF800000> : vector<16xf32>
    %98 = vector.multi_reduction <maximumf>, %97, %cst_40 [1] : vector<16x16xf32> to vector<16xf32>
    %99 = vector.shape_cast %98 : vector<16xf32> to vector<16x1xf32>
    %100 = vector.broadcast %99 : vector<16x1xf32> to vector<16x16xf32>
    %101 = arith.subf %97, %100 : vector<16x16xf32>
    %102 = math.exp %101 : vector<16x16xf32>
    %cst_41 = arith.constant dense<0.000000e+00> : vector<16xf32>
    %103 = vector.multi_reduction <add>, %102, %cst_41 [1] : vector<16x16xf32> to vector<16xf32>
    %104 = vector.shape_cast %103 : vector<16xf32> to vector<16x1xf32>
    %cst_42 = arith.constant 1.000000e+00 : f32
    %105 = vector.broadcast %cst_42 : f32 to vector<16x1xf32>
    %106 = arith.divf %105, %104 : vector<16x1xf32>
    %107 = vector.broadcast %106 : vector<16x1xf32> to vector<16x16xf32>
    %108 = arith.mulf %102, %107 : vector<16x16xf32>
    %cst_43 = arith.constant dense<0.000000e+00> : vector<16x32xf32>
    %109 = tpu.matmul %108, %89, %cst_43 {dimension_numbers = #tpu.dot_dimension_numbers<[1], [0], [0], [1], [0, 0, 1, 1], [], []>} : vector<16x16xf32>, vector<16x32xf32>, vector<16x32xf32> -> vector<16x32xf32>
    %110 = vector.extract_strided_slice %51 {offsets = [0, 64], sizes = [16, 32], strides = [1, 1]} : vector<16x128xf32> to vector<16x32xf32>
    %111 = vector.extract_strided_slice %53 {offsets = [0, 64], sizes = [16, 32], strides = [1, 1]} : vector<16x256xf32> to vector<16x32xf32>
    %112 = vector.extract_strided_slice %53 {offsets = [0, 192], sizes = [16, 32], strides = [1, 1]} : vector<16x256xf32> to vector<16x32xf32>
    %cst_44 = arith.constant dense<0.000000e+00> : vector<16x16xf32>
    %113 = tpu.matmul %110, %111, %cst_44 {dimension_numbers = #tpu.dot_dimension_numbers<[1], [1], [0], [0], [0, 0, 1, 0], [], []>} : vector<16x32xf32>, vector<16x32xf32>, vector<16x16xf32> -> vector<16x16xf32>
    %cst_45 = arith.constant 0.176776692 : f32
    %114 = vector.broadcast %cst_45 : f32 to vector<16x16xf32>
    %115 = arith.mulf %113, %114 : vector<16x16xf32>
    %116 = vector.broadcast %60 : vector<16x1xf32> to vector<16x16xf32>
    %117 = arith.mulf %116, %115 : vector<16x16xf32>
    %118 = vector.broadcast %61 : vector<16x1xf32> to vector<16x16xf32>
    %119 = arith.mulf %118, %63 : vector<16x16xf32>
    %120 = arith.addf %117, %119 : vector<16x16xf32>
    %cst_46 = arith.constant dense<0xFF800000> : vector<16xf32>
    %121 = vector.multi_reduction <maximumf>, %120, %cst_46 [1] : vector<16x16xf32> to vector<16xf32>
    %122 = vector.shape_cast %121 : vector<16xf32> to vector<16x1xf32>
    %123 = vector.broadcast %122 : vector<16x1xf32> to vector<16x16xf32>
    %124 = arith.subf %120, %123 : vector<16x16xf32>
    %125 = math.exp %124 : vector<16x16xf32>
    %cst_47 = arith.constant dense<0.000000e+00> : vector<16xf32>
    %126 = vector.multi_reduction <add>, %125, %cst_47 [1] : vector<16x16xf32> to vector<16xf32>
    %127 = vector.shape_cast %126 : vector<16xf32> to vector<16x1xf32>
    %cst_48 = arith.constant 1.000000e+00 : f32
    %128 = vector.broadcast %cst_48 : f32 to vector<16x1xf32>
    %129 = arith.divf %128, %127 : vector<16x1xf32>
    %130 = vector.broadcast %129 : vector<16x1xf32> to vector<16x16xf32>
    %131 = arith.mulf %125, %130 : vector<16x16xf32>
    %cst_49 = arith.constant dense<0.000000e+00> : vector<16x32xf32>
    %132 = tpu.matmul %131, %112, %cst_49 {dimension_numbers = #tpu.dot_dimension_numbers<[1], [0], [0], [1], [0, 0, 1, 1], [], []>} : vector<16x16xf32>, vector<16x32xf32>, vector<16x32xf32> -> vector<16x32xf32>
    %133 = vector.extract_strided_slice %51 {offsets = [0, 96], sizes = [16, 32], strides = [1, 1]} : vector<16x128xf32> to vector<16x32xf32>
    %134 = vector.extract_strided_slice %53 {offsets = [0, 96], sizes = [16, 32], strides = [1, 1]} : vector<16x256xf32> to vector<16x32xf32>
    %135 = vector.extract_strided_slice %53 {offsets = [0, 224], sizes = [16, 32], strides = [1, 1]} : vector<16x256xf32> to vector<16x32xf32>
    %cst_50 = arith.constant dense<0.000000e+00> : vector<16x16xf32>
    %136 = tpu.matmul %133, %134, %cst_50 {dimension_numbers = #tpu.dot_dimension_numbers<[1], [1], [0], [0], [0, 0, 1, 0], [], []>} : vector<16x32xf32>, vector<16x32xf32>, vector<16x16xf32> -> vector<16x16xf32>
    %cst_51 = arith.constant 0.176776692 : f32
    %137 = vector.broadcast %cst_51 : f32 to vector<16x16xf32>
    %138 = arith.mulf %136, %137 : vector<16x16xf32>
    %139 = vector.broadcast %60 : vector<16x1xf32> to vector<16x16xf32>
    %140 = arith.mulf %139, %138 : vector<16x16xf32>
    %141 = vector.broadcast %61 : vector<16x1xf32> to vector<16x16xf32>
    %142 = arith.mulf %141, %63 : vector<16x16xf32>
    %143 = arith.addf %140, %142 : vector<16x16xf32>
    %cst_52 = arith.constant dense<0xFF800000> : vector<16xf32>
    %144 = vector.multi_reduction <maximumf>, %143, %cst_52 [1] : vector<16x16xf32> to vector<16xf32>
    %145 = vector.shape_cast %144 : vector<16xf32> to vector<16x1xf32>
    %146 = vector.broadcast %145 : vector<16x1xf32> to vector<16x16xf32>
    %147 = arith.subf %143, %146 : vector<16x16xf32>
    %148 = math.exp %147 : vector<16x16xf32>
    %cst_53 = arith.constant dense<0.000000e+00> : vector<16xf32>
    %149 = vector.multi_reduction <add>, %148, %cst_53 [1] : vector<16x16xf32> to vector<16xf32>
    %150 = vector.shape_cast %149 : vector<16xf32> to vector<16x1xf32>
    %cst_54 = arith.constant 1.000000e+00 : f32
    %151 = vector.broadcast %cst_54 : f32 to vector<16x1xf32>
    %152 = arith.divf %151, %150 : vector<16x1xf32>
    %153 = vector.broadcast %152 : vector<16x1xf32> to vector<16x16xf32>
    %154 = arith.mulf %148, %153 : vector<16x16xf32>
    %cst_55 = arith.constant dense<0.000000e+00> : vector<16x32xf32>
    %155 = tpu.matmul %154, %135, %cst_55 {dimension_numbers = #tpu.dot_dimension_numbers<[1], [0], [0], [1], [0, 0, 1, 1], [], []>} : vector<16x16xf32>, vector<16x32xf32>, vector<16x32xf32> -> vector<16x32xf32>
    %156 = tpu.concatenate %86, %109, %132, %155 in 1 : vector<16x32xf32>, vector<16x32xf32>, vector<16x32xf32>, vector<16x32xf32> -> vector<16x128xf32>
    %c0_56 = arith.constant 0 : index
    %c0_57 = arith.constant 0 : index
    %157 = vector.load %arg11[%c0_56, %c0_57] : memref<128x32xf32, #tpu.memory_space<vmem>>, vector<128x32xf32>
    %cst_58 = arith.constant dense<0.000000e+00> : vector<16x32xf32>
    %158 = tpu.matmul %156, %157, %cst_58 {dimension_numbers = #tpu.dot_dimension_numbers<[1], [0], [0], [1], [0, 0, 1, 1], [], []>} : vector<16x128xf32>, vector<128x32xf32>, vector<16x32xf32> -> vector<16x32xf32>
    %c0_59 = arith.constant 0 : index
    %c0_60 = arith.constant 0 : index
    %159 = vector.load %arg12[%c0_59, %c0_60] : memref<1x32xf32, #tpu.memory_space<vmem>>, vector<1x32xf32>
    %160 = vector.broadcast %159 : vector<1x32xf32> to vector<16x32xf32>
    %161 = arith.addf %158, %160 : vector<16x32xf32>
    %162 = arith.addf %161, %49 : vector<16x32xf32>
    %163 = vector.shape_cast %162 : vector<16x32xf32> to vector<1x16x32xf32>
    %c0_61 = arith.constant 0 : index
    %c0_62 = arith.constant 0 : index
    %c0_63 = arith.constant 0 : index
    %164 = vector.load %arg13[%c0_61, %c0_62, %c0_63] : memref<1x16x32xf32, #tpu.memory_space<vmem>>, vector<1x16x32xf32>
    tpu.vector_store %arg13[%c0_61, %c0_62, %c0_63], %163 {strides = array<i32>} : memref<1x16x32xf32, #tpu.memory_space<vmem>>, vector<1x16x32xf32>,
    return
  }
  func.func @transform_0(%arg0: i32, %arg1: i32) -> (i32, i32, i32) {
    %c0_i32 = arith.constant 0 : i32
    %c0_i32_0 = arith.constant 0 : i32
    %c0_i32_1 = arith.constant 0 : i32
    return %arg0, %c0_i32, %c0_i32_0 : i32, i32, i32
  }
  func.func @transform_1(%arg0: i32, %arg1: i32) -> (i32, i32, i32) {
    %c0_i32 = arith.constant 0 : i32
    %c0_i32_0 = arith.constant 0 : i32
    return %arg0, %arg1, %c0_i32 : i32, i32, i32
  }
  func.func @transform_2(%arg0: i32, %arg1: i32) -> (i32, i32, i32) {
    %c0_i32 = arith.constant 0 : i32
    %c0_i32_0 = arith.constant 0 : i32
    return %arg0, %arg1, %c0_i32 : i32, i32, i32
  }
  func.func @transform_3(%arg0: i32, %arg1: i32) -> (i32, i32) {
    %c0_i32 = arith.constant 0 : i32
    %c0_i32_0 = arith.constant 0 : i32
    %c0_i32_1 = arith.constant 0 : i32
    return %c0_i32, %c0_i32_0 : i32, i32
  }
  func.func @transform_4(%arg0: i32, %arg1: i32) -> (i32, i32) {
    %c0_i32 = arith.constant 0 : i32
    %c0_i32_0 = arith.constant 0 : i32
    %c0_i32_1 = arith.constant 0 : i32
    return %c0_i32, %c0_i32_0 : i32, i32
  }
  func.func @transform_5(%arg0: i32, %arg1: i32) -> (i32, i32) {
    %c0_i32 = arith.constant 0 : i32
    %c0_i32_0 = arith.constant 0 : i32
    %c0_i32_1 = arith.constant 0 : i32
    return %c0_i32, %c0_i32_0 : i32, i32
  }
  func.func @transform_6(%arg0: i32, %arg1: i32) -> (i32, i32) {
    %c0_i32 = arith.constant 0 : i32
    %c0_i32_0 = arith.constant 0 : i32
    %c0_i32_1 = arith.constant 0 : i32
    return %c0_i32, %c0_i32_0 : i32, i32
  }
  func.func @transform_7(%arg0: i32, %arg1: i32) -> (i32, i32) {
    %c0_i32 = arith.constant 0 : i32
    %c0_i32_0 = arith.constant 0 : i32
    %c0_i32_1 = arith.constant 0 : i32
    return %c0_i32, %c0_i32_0 : i32, i32
  }
  func.func @transform_8(%arg0: i32, %arg1: i32) -> (i32, i32) {
    %c0_i32 = arith.constant 0 : i32
    %c0_i32_0 = arith.constant 0 : i32
    %c0_i32_1 = arith.constant 0 : i32
    return %c0_i32, %c0_i32_0 : i32, i32
  }
  func.func @transform_9(%arg0: i32, %arg1: i32) -> (i32, i32) {
    %c0_i32 = arith.constant 0 : i32
    %c0_i32_0 = arith.constant 0 : i32
    %c0_i32_1 = arith.constant 0 : i32
    return %c0_i32, %c0_i32_0 : i32, i32
  }
  func.func @transform_10(%arg0: i32, %arg1: i32) -> (i32, i32) {
    %c0_i32 = arith.constant 0 : i32
    %c0_i32_0 = arith.constant 0 : i32
    %c0_i32_1 = arith.constant 0 : i32
    return %c0_i32, %c0_i32_0 : i32, i32
  }
  func.func @transform_11(%arg0: i32, %arg1: i32) -> (i32, i32, i32) {
    %c0_i32 = arith.constant 0 : i32
    %c0_i32_0 = arith.constant 0 : i32
    return %arg0, %arg1, %c0_i32 : i32, i32, i32
  }
}

module attributes {stable_mosaic.version = 11 : i64} {
  func.func @_mlp_adapter_kernel(%arg0: i32, %arg1: memref<32x32xf32, #tpu.memory_space<vmem>>, %arg2: memref<32x32xf32, #tpu.memory_space<vmem>>, %arg3: memref<1x32xf32, #tpu.memory_space<vmem>>, %arg4: memref<1x32xf32, #tpu.memory_space<vmem>>, %arg5: memref<32x128xf32, #tpu.memory_space<vmem>>, %arg6: memref<1x128xf32, #tpu.memory_space<vmem>>, %arg7: memref<128x32xf32, #tpu.memory_space<vmem>>, %arg8: memref<1x32xf32, #tpu.memory_space<vmem>>, %arg9: memref<32x64xf32, #tpu.memory_space<vmem>>, %arg10: memref<1x64xf32, #tpu.memory_space<vmem>>, %arg11: memref<64x32xf32, #tpu.memory_space<vmem>>, %arg12: memref<1x32xf32, #tpu.memory_space<vmem>>, %arg13: memref<1xf32, #tpu.memory_space<smem>>, %arg14: memref<32x32xf32, #tpu.memory_space<vmem>>) attributes {dimension_semantics = [#tpu.dimension_semantics<parallel>], iteration_bounds = array<i64: 1>, scalar_prefetch = 0 : i64, scratch_operands = 0 : i64, tpu.core_type = #tpu.core_type<tc>, window_params = [{transform_indices = @transform_0, window_bounds = array<i64: 32, 32>}, {transform_indices = @transform_1, window_bounds = array<i64: 32, 32>}, {pipeline_mode = #tpu.pipeline_mode<synchronous>, transform_indices = @transform_2, window_bounds = array<i64: 1, 32>}, {pipeline_mode = #tpu.pipeline_mode<synchronous>, transform_indices = @transform_3, window_bounds = array<i64: 1, 32>}, {pipeline_mode = #tpu.pipeline_mode<synchronous>, transform_indices = @transform_4, window_bounds = array<i64: 32, 128>}, {pipeline_mode = #tpu.pipeline_mode<synchronous>, transform_indices = @transform_5, window_bounds = array<i64: 1, 128>}, {pipeline_mode = #tpu.pipeline_mode<synchronous>, transform_indices = @transform_6, window_bounds = array<i64: 128, 32>}, {pipeline_mode = #tpu.pipeline_mode<synchronous>, transform_indices = @transform_7, window_bounds = array<i64: 1, 32>}, {pipeline_mode = #tpu.pipeline_mode<synchronous>, transform_indices = @transform_8, window_bounds = array<i64: 32, 64>}, {pipeline_mode = #tpu.pipeline_mode<synchronous>, transform_indices = @transform_9, window_bounds = array<i64: 1, 64>}, {pipeline_mode = #tpu.pipeline_mode<synchronous>, transform_indices = @transform_10, window_bounds = array<i64: 64, 32>}, {pipeline_mode = #tpu.pipeline_mode<synchronous>, transform_indices = @transform_11, window_bounds = array<i64: 1, 32>}, {transform_indices = @transform_12, window_bounds = array<i64: 1>}, {transform_indices = @transform_13, window_bounds = array<i64: 32, 32>}]} {
    %c0 = arith.constant 0 : index
    %c0_0 = arith.constant 0 : index
    %0 = vector.load %arg1[%c0, %c0_0] : memref<32x32xf32, #tpu.memory_space<vmem>>, vector<32x32xf32>
    %c0_1 = arith.constant 0 : index
    %c0_2 = arith.constant 0 : index
    %1 = vector.load %arg3[%c0_1, %c0_2] : memref<1x32xf32, #tpu.memory_space<vmem>>, vector<1x32xf32>
    %c0_3 = arith.constant 0 : index
    %c0_4 = arith.constant 0 : index
    %2 = vector.load %arg4[%c0_3, %c0_4] : memref<1x32xf32, #tpu.memory_space<vmem>>, vector<1x32xf32>
    %cst = arith.constant dense<0.000000e+00> : vector<32xf32>
    %3 = vector.multi_reduction <add>, %0, %cst [1] : vector<32x32xf32> to vector<32xf32>
    %4 = vector.shape_cast %3 : vector<32xf32> to vector<32x1xf32>
    %cst_5 = arith.constant 3.200000e+01 : f32
    %5 = vector.broadcast %cst_5 : f32 to vector<32x1xf32>
    %6 = arith.divf %4, %5 : vector<32x1xf32>
    %7 = vector.broadcast %6 : vector<32x1xf32> to vector<32x32xf32>
    %8 = arith.subf %0, %7 : vector<32x32xf32>
    %9 = arith.mulf %8, %8 : vector<32x32xf32>
    %cst_6 = arith.constant dense<0.000000e+00> : vector<32xf32>
    %10 = vector.multi_reduction <add>, %9, %cst_6 [1] : vector<32x32xf32> to vector<32xf32>
    %11 = vector.shape_cast %10 : vector<32xf32> to vector<32x1xf32>
    %cst_7 = arith.constant 3.200000e+01 : f32
    %12 = vector.broadcast %cst_7 : f32 to vector<32x1xf32>
    %13 = arith.divf %11, %12 : vector<32x1xf32>
    %14 = vector.broadcast %6 : vector<32x1xf32> to vector<32x32xf32>
    %15 = arith.subf %0, %14 : vector<32x32xf32>
    %cst_8 = arith.constant 9.99999974E-6 : f32
    %16 = vector.broadcast %cst_8 : f32 to vector<32x1xf32>
    %17 = arith.addf %13, %16 : vector<32x1xf32>
    %18 = math.rsqrt %17 : vector<32x1xf32>
    %19 = vector.broadcast %18 : vector<32x1xf32> to vector<32x32xf32>
    %20 = arith.mulf %15, %19 : vector<32x32xf32>
    %21 = vector.broadcast %1 : vector<1x32xf32> to vector<32x32xf32>
    %22 = arith.mulf %20, %21 : vector<32x32xf32>
    %23 = vector.broadcast %2 : vector<1x32xf32> to vector<32x32xf32>
    %24 = arith.addf %22, %23 : vector<32x32xf32>
    %c0_9 = arith.constant 0 : index
    %c0_10 = arith.constant 0 : index
    %25 = vector.load %arg5[%c0_9, %c0_10] : memref<32x128xf32, #tpu.memory_space<vmem>>, vector<32x128xf32>
    %cst_11 = arith.constant dense<0.000000e+00> : vector<32x128xf32>
    %26 = tpu.matmul %24, %25, %cst_11 {dimension_numbers = #tpu.dot_dimension_numbers<[1], [0], [0], [1], [0, 0, 1, 1], [], []>} : vector<32x32xf32>, vector<32x128xf32>, vector<32x128xf32> -> vector<32x128xf32>
    %c0_12 = arith.constant 0 : index
    %c0_13 = arith.constant 0 : index
    %27 = vector.load %arg6[%c0_12, %c0_13] : memref<1x128xf32, #tpu.memory_space<vmem>>, vector<1x128xf32>
    %28 = vector.broadcast %27 : vector<1x128xf32> to vector<32x128xf32>
    %29 = arith.addf %26, %28 : vector<32x128xf32>
    %cst_14 = arith.constant 5.000000e-01 : f32
    %30 = vector.broadcast %cst_14 : f32 to vector<32x128xf32>
    %31 = arith.mulf %30, %29 : vector<32x128xf32>
    %cst_15 = arith.constant 0.707106769 : f32
    %32 = vector.broadcast %cst_15 : f32 to vector<32x128xf32>
    %33 = arith.mulf %29, %32 : vector<32x128xf32>
    %34 = math.absf %33 : vector<32x128xf32>
    %cst_16 = arith.constant 0.327591091 : f32
    %35 = vector.broadcast %cst_16 : f32 to vector<32x128xf32>
    %36 = arith.mulf %35, %34 : vector<32x128xf32>
    %cst_17 = arith.constant 1.000000e+00 : f32
    %37 = vector.broadcast %cst_17 : f32 to vector<32x128xf32>
    %38 = arith.addf %37, %36 : vector<32x128xf32>
    %cst_18 = arith.constant 1.000000e+00 : f32
    %39 = vector.broadcast %cst_18 : f32 to vector<32x128xf32>
    %40 = arith.divf %39, %38 : vector<32x128xf32>
    %cst_19 = arith.constant 1.06140542 : f32
    %41 = vector.broadcast %cst_19 : f32 to vector<32x128xf32>
    %42 = arith.mulf %40, %41 : vector<32x128xf32>
    %cst_20 = arith.constant -1.45315206 : f32
    %43 = vector.broadcast %cst_20 : f32 to vector<32x128xf32>
    %44 = arith.addf %43, %42 : vector<32x128xf32>
    %45 = arith.mulf %40, %44 : vector<32x128xf32>
    %cst_21 = arith.constant 1.42141378 : f32
    %46 = vector.broadcast %cst_21 : f32 to vector<32x128xf32>
    %47 = arith.addf %46, %45 : vector<32x128xf32>
    %48 = arith.mulf %40, %47 : vector<32x128xf32>
    %cst_22 = arith.constant -0.284496725 : f32
    %49 = vector.broadcast %cst_22 : f32 to vector<32x128xf32>
    %50 = arith.addf %49, %48 : vector<32x128xf32>
    %51 = arith.mulf %40, %50 : vector<32x128xf32>
    %cst_23 = arith.constant 0.254829586 : f32
    %52 = vector.broadcast %cst_23 : f32 to vector<32x128xf32>
    %53 = arith.addf %52, %51 : vector<32x128xf32>
    %54 = arith.mulf %40, %53 : vector<32x128xf32>
    %cst_24 = arith.constant 0.000000e+00 : f32
    %55 = vector.broadcast %cst_24 : f32 to vector<32x128xf32>
    %56 = arith.subf %55, %34 : vector<32x128xf32>
    %57 = arith.mulf %56, %34 : vector<32x128xf32>
    %58 = math.exp %57 : vector<32x128xf32>
    %59 = arith.mulf %54, %58 : vector<32x128xf32>
    %cst_25 = arith.constant 1.000000e+00 : f32
    %60 = vector.broadcast %cst_25 : f32 to vector<32x128xf32>
    %61 = arith.subf %60, %59 : vector<32x128xf32>
    %cst_26 = arith.constant 0.000000e+00 : f32
    %62 = vector.broadcast %cst_26 : f32 to vector<32x128xf32>
    %63 = arith.cmpf olt, %33, %62 : vector<32x128xf32>
    %cst_27 = arith.constant 0.000000e+00 : f32
    %64 = vector.broadcast %cst_27 : f32 to vector<32x128xf32>
    %65 = arith.subf %64, %61 : vector<32x128xf32>
    %66 = arith.select %63, %65, %61 : vector<32x128xi1>, vector<32x128xf32>
    %cst_28 = arith.constant 1.000000e+00 : f32
    %67 = vector.broadcast %cst_28 : f32 to vector<32x128xf32>
    %68 = arith.addf %67, %66 : vector<32x128xf32>
    %69 = arith.mulf %31, %68 : vector<32x128xf32>
    %c0_29 = arith.constant 0 : index
    %c0_30 = arith.constant 0 : index
    %70 = vector.load %arg7[%c0_29, %c0_30] : memref<128x32xf32, #tpu.memory_space<vmem>>, vector<128x32xf32>
    %cst_31 = arith.constant dense<0.000000e+00> : vector<32x32xf32>
    %71 = tpu.matmul %69, %70, %cst_31 {dimension_numbers = #tpu.dot_dimension_numbers<[1], [0], [0], [1], [0, 0, 1, 1], [], []>} : vector<32x128xf32>, vector<128x32xf32>, vector<32x32xf32> -> vector<32x32xf32>
    %c0_32 = arith.constant 0 : index
    %c0_33 = arith.constant 0 : index
    %72 = vector.load %arg8[%c0_32, %c0_33] : memref<1x32xf32, #tpu.memory_space<vmem>>, vector<1x32xf32>
    %73 = vector.broadcast %72 : vector<1x32xf32> to vector<32x32xf32>
    %74 = arith.addf %71, %73 : vector<32x32xf32>
    %75 = arith.addf %74, %24 : vector<32x32xf32>
    %c0_34 = arith.constant 0 : index
    %c0_35 = arith.constant 0 : index
    %76 = vector.load %arg2[%c0_34, %c0_35] : memref<32x32xf32, #tpu.memory_space<vmem>>, vector<32x32xf32>
    %c0_36 = arith.constant 0 : index
    %c0_37 = arith.constant 0 : index
    %77 = vector.load %arg9[%c0_36, %c0_37] : memref<32x64xf32, #tpu.memory_space<vmem>>, vector<32x64xf32>
    %cst_38 = arith.constant dense<0.000000e+00> : vector<32x64xf32>
    %78 = tpu.matmul %76, %77, %cst_38 {dimension_numbers = #tpu.dot_dimension_numbers<[1], [0], [0], [1], [0, 0, 1, 1], [], []>} : vector<32x32xf32>, vector<32x64xf32>, vector<32x64xf32> -> vector<32x64xf32>
    %c0_39 = arith.constant 0 : index
    %c0_40 = arith.constant 0 : index
    %79 = vector.load %arg10[%c0_39, %c0_40] : memref<1x64xf32, #tpu.memory_space<vmem>>, vector<1x64xf32>
    %80 = vector.broadcast %79 : vector<1x64xf32> to vector<32x64xf32>
    %81 = arith.addf %78, %80 : vector<32x64xf32>
    %cst_41 = arith.constant 0.000000e+00 : f32
    %82 = vector.broadcast %cst_41 : f32 to vector<32x64xf32>
    %83 = arith.maximumf %81, %82 : vector<32x64xf32>
    %c0_42 = arith.constant 0 : index
    %c0_43 = arith.constant 0 : index
    %84 = vector.load %arg11[%c0_42, %c0_43] : memref<64x32xf32, #tpu.memory_space<vmem>>, vector<64x32xf32>
    %cst_44 = arith.constant dense<0.000000e+00> : vector<32x32xf32>
    %85 = tpu.matmul %83, %84, %cst_44 {dimension_numbers = #tpu.dot_dimension_numbers<[1], [0], [0], [1], [0, 0, 1, 1], [], []>} : vector<32x64xf32>, vector<64x32xf32>, vector<32x32xf32> -> vector<32x32xf32>
    %c0_45 = arith.constant 0 : index
    %c0_46 = arith.constant 0 : index
    %86 = vector.load %arg12[%c0_45, %c0_46] : memref<1x32xf32, #tpu.memory_space<vmem>>, vector<1x32xf32>
    %87 = vector.broadcast %86 : vector<1x32xf32> to vector<32x32xf32>
    %88 = arith.addf %85, %87 : vector<32x32xf32>
    %c0_47 = arith.constant 0 : index
    %89 = memref.load %arg13[%c0_47] : memref<1xf32, #tpu.memory_space<smem>>
    %90 = vector.broadcast %89 : f32 to vector<32x32xf32>
    %91 = arith.mulf %88, %90 : vector<32x32xf32>
    %92 = arith.addf %75, %91 : vector<32x32xf32>
    %c0_48 = arith.constant 0 : index
    %c0_49 = arith.constant 0 : index
    %93 = vector.load %arg14[%c0_48, %c0_49] : memref<32x32xf32, #tpu.memory_space<vmem>>, vector<32x32xf32>
    tpu.vector_store %arg14[%c0_48, %c0_49], %92 {strides = array<i32>} : memref<32x32xf32, #tpu.memory_space<vmem>>, vector<32x32xf32>,
    return
  }
  func.func @transform_0(%arg0: i32) -> (i32, i32) {
    %c0_i32 = arith.constant 0 : i32
    %c0_i32_0 = arith.constant 0 : i32
    return %arg0, %c0_i32 : i32, i32
  }
  func.func @transform_1(%arg0: i32) -> (i32, i32) {
    %c0_i32 = arith.constant 0 : i32
    %c0_i32_0 = arith.constant 0 : i32
    return %arg0, %c0_i32 : i32, i32
  }
  func.func @transform_2(%arg0: i32) -> (i32, i32) {
    %c0_i32 = arith.constant 0 : i32
    %c0_i32_0 = arith.constant 0 : i32
    %c0_i32_1 = arith.constant 0 : i32
    return %c0_i32, %c0_i32_0 : i32, i32
  }
  func.func @transform_3(%arg0: i32) -> (i32, i32) {
    %c0_i32 = arith.constant 0 : i32
    %c0_i32_0 = arith.constant 0 : i32
    %c0_i32_1 = arith.constant 0 : i32
    return %c0_i32, %c0_i32_0 : i32, i32
  }
  func.func @transform_4(%arg0: i32) -> (i32, i32) {
    %c0_i32 = arith.constant 0 : i32
    %c0_i32_0 = arith.constant 0 : i32
    %c0_i32_1 = arith.constant 0 : i32
    return %c0_i32, %c0_i32_0 : i32, i32
  }
  func.func @transform_5(%arg0: i32) -> (i32, i32) {
    %c0_i32 = arith.constant 0 : i32
    %c0_i32_0 = arith.constant 0 : i32
    %c0_i32_1 = arith.constant 0 : i32
    return %c0_i32, %c0_i32_0 : i32, i32
  }
  func.func @transform_6(%arg0: i32) -> (i32, i32) {
    %c0_i32 = arith.constant 0 : i32
    %c0_i32_0 = arith.constant 0 : i32
    %c0_i32_1 = arith.constant 0 : i32
    return %c0_i32, %c0_i32_0 : i32, i32
  }
  func.func @transform_7(%arg0: i32) -> (i32, i32) {
    %c0_i32 = arith.constant 0 : i32
    %c0_i32_0 = arith.constant 0 : i32
    %c0_i32_1 = arith.constant 0 : i32
    return %c0_i32, %c0_i32_0 : i32, i32
  }
  func.func @transform_8(%arg0: i32) -> (i32, i32) {
    %c0_i32 = arith.constant 0 : i32
    %c0_i32_0 = arith.constant 0 : i32
    %c0_i32_1 = arith.constant 0 : i32
    return %c0_i32, %c0_i32_0 : i32, i32
  }
  func.func @transform_9(%arg0: i32) -> (i32, i32) {
    %c0_i32 = arith.constant 0 : i32
    %c0_i32_0 = arith.constant 0 : i32
    %c0_i32_1 = arith.constant 0 : i32
    return %c0_i32, %c0_i32_0 : i32, i32
  }
  func.func @transform_10(%arg0: i32) -> (i32, i32) {
    %c0_i32 = arith.constant 0 : i32
    %c0_i32_0 = arith.constant 0 : i32
    %c0_i32_1 = arith.constant 0 : i32
    return %c0_i32, %c0_i32_0 : i32, i32
  }
  func.func @transform_11(%arg0: i32) -> (i32, i32) {
    %c0_i32 = arith.constant 0 : i32
    %c0_i32_0 = arith.constant 0 : i32
    %c0_i32_1 = arith.constant 0 : i32
    return %c0_i32, %c0_i32_0 : i32, i32
  }
  func.func @transform_12(%arg0: i32) -> i32 {
    %c0_i32 = arith.constant 0 : i32
    %c0_i32_0 = arith.constant 0 : i32
    return %c0_i32 : i32
  }
  func.func @transform_13(%arg0: i32) -> (i32, i32) {
    %c0_i32 = arith.constant 0 : i32
    %c0_i32_0 = arith.constant 0 : i32
    return %arg0, %c0_i32 : i32, i32
  }
}

</mosaic_0001>

<bundles_post_ra>
// kernel: attention_block_forward.2
= control target key start
LH: loop header
LB: loop body
LE: loop exit
PB: predicated region body
PF: predicated region fallthrough
CT: control target
= control target key end

     0   :  { %s2462_s17 = smov 0   ;;  %s2464_s18 = smov 0   ;;  %s2783_s0 = inlined_call_operand.vmem [shape: f32[2,16,32], index: 0, kind: input, shape index: {}, may-alias: {0,1}]   ;;  %s2784_s1 = inlined_call_operand.vmem [shape: f32[2,16,32], index: 1, kind: input, shape index: {}, may-alias: {0,1}]   ;;  %s2785_s2 = inlined_call_operand.vmem [shape: f32[2,16,16], index: 2, kind: input, shape index: {}]   ;;  %s2786_s3 = inlined_call_operand.vmem [shape: f32[1,32], index: 3, kind: input, shape index: {}]   ;;  %s2787_s4 = inlined_call_operand.vmem [shape: f32[1,32], index: 4, kind: input, shape index: {}]   ;;  %s2788_s5 = inlined_call_operand.vmem [shape: f32[32,128], index: 5, kind: input, shape index: {}]   ;;  %s2789_s6 = inlined_call_operand.vmem [shape: f32[32,256], index: 6, kind: input, shape index: {}]   ;;  %s2790_s7 = inlined_call_operand.vmem [shape: f32[32,2], index: 7, kind: input, shape index: {}]   ;;  %s2791_s8 = inlined_call_operand.vmem [shape: f32[1,2], index: 8, kind: input, shape index: {}]   ;;  %s2792_s9 = inlined_call_operand.vmem [shape: f32[128,32], index: 9, kind: input, shape index: {}]   ;;  %s2793_s10 = inlined_call_operand.vmem [shape: f32[1,32], index: 10, kind: input, shape index: {}]   ;;  %s2794_s11 = inlined_call_operand.vmem [shape: f32[2,16,32], index: 11, kind: output, shape index: {}]  }
   0x1   :  { %s2466_s19 = smov 0  }
   0x2 LB: > { %s33_s20 = sadd.s32 1, %s2390_s18  ;;  %p1930_p0 = scmp.ge.s32.totalorder %s2394_s19, 1  ;;  %s2394_s19 = sphi %s2466_s19, %s21_s19   ;;  %s2390_s18 = sphi %s2464_s18, %s2798_s18   ;;  %s2386_s17 = sphi %s2462_s17, %s2797_s17  }
   0x3   : > { %p35_p1 = scmp.ge.s32.totalorder %s33_s20, 2  ;;  %p385_p2 = scmp.lt.s32.totalorder %s2394_s19, 3 }
   0x5   : > { %s2800_s20 = smov (%p35_p1, %s33_s20), 0  ;;  %p386_p3 = pnand %p1930_p0, %p385_p2 }
   0x6   : > { %p447_p4 = scmp.lt.s32.totalorder (!%p386_p3), %s2386_s17, 1  ;;  %vm486_vm0 = vcmask (!%p386_p3), 261120   ;;  %v562_v28 = vld [vmem:[%s2788_s5] sm:$0xff] (!%p386_p3)  ;;  %v563_v29 = vld [vmem:[%s2788_s5 + $0x8] sm:$0xff] (!%p386_p3)  ;;  %v564_v31 = vld [vmem:[%s2788_s5 + $0x10] sm:$0xff] (!%p386_p3)  ;;  %s2399_s15 = smov (!%p386_p3), 96  }
   0x7   : > { %389 = sbr.rel (%p386_p3) target bundleno = 2870 (0xb36), region = 64  ;;  %v2154_v30 = vpack.c.bf16 (!%p386_p3), %v563_v29, %v562_v28  ;;  %v565_v32 = vld [vmem:[%s2788_s5 + $0x18] sm:$0xff] (!%p386_p3)  ;;  %v648_v34 = vld [vmem:[%s2789_s6 + $0x8] sm:$0xff] (!%p386_p3)  ;;  %v1939_v50 = vld [vmem:[%s2786_s3] ss:$0 sm:$0xff] (!%p386_p3)  ;;  %vm943_vm2 = vcmask (!%p386_p3), 130048  }
   0x8   : > { %v2158_v33 = vpack.c.bf16 (!%p386_p3), %v565_v32, %v564_v31  ;;  %v650_v35 = vld [vmem:[%s2789_s6 + $0x18] sm:$0xff] (!%p386_p3)  ;;  %v1940_v52 = vld [vmem:[%s2787_s4] ss:$0 sm:$0xff] (!%p386_p3)  ;;  %v649_v58 = vld [vmem:[%s2789_s6 + $0x10] sm:$0xff] (!%p386_p3)  ;;  %s2400_s25 = smov (!%p386_p3), 64   ;;  %s2401_s26 = smov (!%p386_p3), 32  }
   0x9   : > { %2155 = vmatprep.subr.bf16.mxu1 (!%p386_p3), %v2154_v30  ;;  %v2162_v36 = vpack.c.bf16 (!%p386_p3), %v650_v35, %v648_v34  ;;  %v647_v57 = vld [vmem:[%s2789_s6] sm:$0xff] (!%p386_p3)  ;;  %v652_v60 = vld [vmem:[%s2789_s6 + $0x28] sm:$0xff] (!%p386_p3)  ;;  %v654_v61 = vld [vmem:[%s2789_s6 + $0x38] sm:$0xff] (!%p386_p3)  ;;  %vm1701_vm3 = vcmask (!%p386_p3), 523264   ;;  %vm1704_vm4 = vcmask (!%p386_p3), 785408  }
   0xa   : > { %2157 = vmatpush3.bf16.msra.mxu1 (!%p386_p3), %v2154_v30  ;;  %v2164_v63 = vpack.c.bf16 (!%p386_p3), %v649_v58, %v647_v57  ;;  %vm2588_vm1 = vmpackc.low (!%p386_p3), %vm486_vm0, %vm486_vm0  ;;  %v1945_v32 = vld [vmem:[%s2791_s8] ss:$0 sm:$0xff] (!%p386_p3) }
   0xb   : > { %2159 = vmatprep.subr.bf16.mxu1 (!%p386_p3), %v2158_v33 }
   0xe   : > { %s2802_s17 = smov (!%p447_p4, %s2386_s17), 1  ;;  %2161 = vmatpush3.bf16.msra.mxu1 %v2158_v33 }
   0xf   : > { %s2480_s21 = sshll.u32 %s2802_s17, 4  ;;  %2163 = vmatprep.subr.bf16.mxu1 %v2162_v36 }
  0x10   : > { %s460_s24 = scalar_lea.vmem %s2784_s1, %s2480_s21  ;;  %s451_s27 = scalar_lea.vmem %s2783_s0, %s2480_s21 }
  0x11   : > { %v530_v0 = vld [vmem:[%s460_s24] sm:$0xff]  ;;  %v531_v1 = vld [vmem:[%s460_s24 + $0x8] sm:$0xff]  ;;  %s470_s24 = scalar_lea.vmem %s2785_s2, %s2480_s21  ;;  %s480_s16 = scalar_lea.vmem %s2794_s11, %s2480_s21 }
  0x12   : > { %v484_v2 = vld [vmem:[%s451_s27] sm:$0xff]  ;;  %v532_v3 = vsel %vm486_vm0, %v530_v0, 0.0  ;;  %v485_v5 = vld [vmem:[%s451_s27 + $0x8] sm:$0xff]  ;;  %v535_v6 = vsel %vm486_vm0, %v531_v1, 0.0 }
  0x13   : > { %v487_v4 = vsel %vm486_vm0, %v484_v2, 0.0  ;;  %533 = vadd.xlane.f32.xlu0 %v532_v3  ;;  %v490_v7 = vsel %vm486_vm0, %v485_v5, 0.0  ;;  %v651_v3 = vld [vmem:[%s2789_s6 + $0x20] sm:$0xff] }
  0x14   : > { %488 = vadd.xlane.f32.xlu1 %v487_v4  ;;  %v653_v4 = vld [vmem:[%s2789_s6 + $0x30] sm:$0xff] }
  0x17   : > { %536 = vadd.xlane.f32.xlu0 %v535_v6  ;;  %v738_v6 = vld [vmem:[%s2790_s7] sm:$0xff] }
  0x18   : > { %491 = vadd.xlane.f32.xlu1 %v490_v7  ;;  %v739_v7 = vld [vmem:[%s2790_s7 + $0x8] sm:$0xff] }
  0xa0   : > { %v534_v8 = vpop.xlane.xlu0 %533 }
  0xa1   : > { %v489_v9 = vpop.xlane.xlu1 %488  ;;  %v538_v10 = vmul.f32 0.03125, %v534_v8  ;;  %v2168_v8 = vpack.c.bf16 %v653_v4, %v651_v3 }
  0xa2   : > { %v494_v11 = vmul.f32 0.03125, %v489_v9  ;;  %v2396_v9 = vmov 0.0  }
  0xa3   : > { %v540_v12 = vsub.f32 %v530_v0, %v538_v10 }
  0xa4   : > { %v2494_v13 = vsub.f32 %v484_v2, %v494_v11  ;;  %v537_v14 = vpop.xlane.xlu0 %536  ;;  %v2166_v2 = vpack.c.bf16 %v654_v61, %v652_v60  ;;  %v2170_v11 = vpack.c.bf16 %v739_v7, %v738_v6 }
  0xa5   : > { %v492_v15 = vpop.xlane.xlu1 %491  ;;  %v539_v16 = vmul.f32 0.03125, %v537_v14  ;;  %v542_v17 = vmul.f32 %v540_v12, %v540_v12  ;;  %v741_v14 = vld [vmem:[%s2790_s7 + $0x18] sm:$0xff] }
  0xa6   : > { %v495_v18 = vmul.f32 0.03125, %v492_v15  ;;  %v498_v19 = vmul.f32 %v2494_v13, %v2494_v13 }
  0xa7   : > { %v541_v20 = vsub.f32 %v531_v1, %v539_v16  ;;  %v544_v21 = vsel %vm486_vm0, %v542_v17, 0.0 }
  0xa8   : > { %v2499_v22 = vsub.f32 %v485_v5, %v495_v18  ;;  %545 = vadd.xlane.f32.xlu0 %v544_v21  ;;  %v500_v24 = vsel %vm486_vm0, %v498_v19, 0.0  ;;  %v2397_v19 = vmov 1  }
  0xa9   : > { %v543_v23 = vmul.f32 %v541_v20, %v541_v20  ;;  %2286 = vset.pattern.permute.xlu0 %v2397_v19 }
  0xaa   : > { %v499_v25 = vmul.f32 %v2499_v22, %v2499_v22 }
  0xab   : > { %v547_v26 = vsel %vm486_vm0, %v543_v23, 0.0 }
  0xac   : > { %548 = vadd.xlane.f32.xlu1 %v547_v26  ;;  %501 = vadd.xlane.f32.xlu0 %v500_v24  ;;  %v503_v27 = vsel %vm486_vm0, %v499_v25, 0.0 }
  0xb0   : > { %504 = vadd.xlane.f32.xlu1 %v503_v27 }
 0x135   : > { %v546_v37 = vpop.xlane.xlu0 %545 }
 0x136   : > { %v550_v38 = vmul.f32 0.03125, %v546_v37 }
 0x138   : > { %v552_v39 = vadd.f32 1e-05, %v550_v38 }
 0x139   : > { %v502_v40 = vpop.xlane.xlu0 %501  ;;  %v549_v41 = vpop.xlane.xlu1 %548 }
 0x13a   : > { %2328 = vrsqrt.f32 %v552_v39  ;;  %v506_v42 = vmul.f32 0.03125, %v502_v40  ;;  %v551_v43 = vmul.f32 0.03125, %v549_v41 }
 0x13c   : > { %v553_v44 = vadd.f32 1e-05, %v551_v43  ;;  %v508_v45 = vadd.f32 1e-05, %v506_v42 }
 0x13d   : > { %v505_v46 = vpop.xlane.xlu1 %504 }
 0x13e   : > { %v507_v47 = vmul.f32 0.03125, %v505_v46  ;;  %2330 = vrsqrt.f32 %v553_v44 }
 0x13f   : > { %2332 = vrsqrt.f32 %v508_v45 }
 0x140   : > { %v509_v48 = vadd.f32 1e-05, %v507_v47 }
 0x142   : > { %2334 = vrsqrt.f32 %v509_v48 }
 0x144   : > { %v2329_v49 = vpop.eup %2328 }
 0x145   : > { %v556_v51 = vmul.f32 %v2329_v49, %v540_v12  ;;  %v829_v49 = vld [vmem:[%s470_s24 + $0x8] sm:$0xff] }
 0x147   : > { %v558_v53 = vmul.f32 %v1939_v50, %v556_v51 }
 0x148   : > { %v2331_v54 = vpop.eup %2330 }
 0x149   : > { %v2530_v55 = vadd.f32 %v1940_v52, %v558_v53  ;;  %v557_v56 = vmul.f32 %v2331_v54, %v541_v20  ;;  %v2333_v59 = vpop.eup %2332  ;;  %v2398_v20 = vmov 0  }
 0x14a   : > { %v512_v0 = vmul.f32 %v2333_v59, %v2494_v13  ;;  %v740_v13 = vld [vmem:[%s2790_s7 + $0x10] sm:$0xff]  ;;  %2285 = vset.pattern.permute.xlu1 %v2398_v20 }
 0x14b   : > { %2049 = vmatprep.mubr.msk.f32.mxu1 %vm486_vm0, %v2530_v55  ;;  %v559_v62 = vmul.f32 %v1939_v50, %v557_v56  ;;  %v2174_v17 = vpack.c.bf16 %v741_v14, %v740_v13 }
 0x14c   : > { %v2335_v5 = vpop.eup %2334  ;;  %v520_v10 = vmul.f32 %v1939_v50, %v512_v0 }
 0x14d   : > { %v2547_v1 = vadd.f32 %v1940_v52, %v559_v62  ;;  %v513_v12 = vmul.f32 %v2335_v5, %v2499_v22 }
 0x14e   : > { %v528_v15 = vadd.f32 %v1940_v52, %v520_v10 }
 0x14f   : > { %2050 = vmatmul.mubr.msk.f32.vlgmr.msra.gmra.mrb[0].mxu1 %vm486_vm0, %v2547_v1  ;;  %v521_v16 = vmul.f32 %v1939_v50, %v513_v12 }
 0x150   : > { %2165 = vmatpush1.bf16.msra.mxu1 %v2164_v63  ;;  %725 = vmatprep.mubr.f32.mxu1 %v2396_v9 }
 0x151   : > { %2167 = vmatprep.subr.bf16.mxu1 %v2166_v2  ;;  %v529_v18 = vadd.f32 %v1940_v52, %v521_v16  ;;  %v828_v52 = vld [vmem:[%s470_s24] sm:$0xff] }
 0x154   : > { %2169 = vmatpush1.bf16.msra.mxu1 %v2168_v8 }
 0x155   : > { %2171 = vmatprep.subr.bf16.mxu1 %v2170_v11 }
 0x157   : > { %1943 = vmatmul.mubr.msk.f32.vlgmr.msra.gmra.mrb[2].mxu1 %vm486_vm0, %v528_v15 }
 0x158   : > { %2173 = vmatpush3.bf16.msra.mxu1 %v2170_v11  ;;  %731 = vmatprep.mubr.f32.mxu1 %v2396_v9 }
 0x159   : > { %2175 = vmatprep.subr.bf16.mxu1 %v2174_v17 }
 0x15b   : > { %1944 = vmatmul.mubr.msk.f32.gmra.mrb[4].mxu1 %vm486_vm0, %v529_v18 }
 0x15c   : > { %2177 = vmatpush3.bf16.msra.mxu1 %v2174_v17  ;;  %2060 = vmatprep.mubr.msk.f32.mxu1 %vm486_vm0, %v2530_v55 }
 0x15f   : > { %2061 = vmatmul.mubr.msk.f32.vlgmr.msra.gmra.mrb[6].mxu1 %vm486_vm0, %v2547_v1 }
 0x222   : > { %v2576_v21 = vpop.f32.mrb[0].mxu1 }
 0x223   : > { %v2578_v22 = vpop.f32.mrb[1].mxu1 }
 0x224   : > { %1049 = vrot.lane.b32.xlu1 %v2578_v22, %s2399_s15  ;;  %2067 = vmatprep.mubr.msk.f32.mxu1 %vm486_vm0, %v2578_v22 }
 0x228   : > { %1051 = vrot.lane.b32.xlu1 %v2576_v21, %s2399_s15 }
 0x22a   : > { %v727_v23 = vpop.f32.mrb[2].mxu1 }
 0x22b   : > { %v729_v24 = vpop.f32.mrb[3].mxu1 }
 0x22e   : > { %v733_v25 = vpop.f32.mrb[4].mxu1 }
 0x22f   : > { %v2178_v27 = vpack.c.bf16 %v733_v25, %v727_v23  ;;  %v735_v28 = vpop.f32.mrb[5].mxu1  ;;  %v2592_v29 = vpack.i.bf16 %v733_v25, %v727_v23 }
 0x230   : > { %v2184_v30 = vpack.c.bf16 %v735_v28, %v729_v24  ;;  %v2594_v31 = vpack.i.bf16 %v735_v28, %v729_v24 }
 0x231   : > { %2281 = vrot.lane.b32.xlu0 %v2592_v29, %s2399_s15  ;;  %2180 = vmatprep.subr.msk.bf16.mxu1 %vm2588_vm1, %v2178_v27 }
 0x232   : > { %v2062_v33 = vpop.f32.mrb[6].mxu1  ;;  %2183 = vmatpush3.bf16.xpose.msk.msra.mxu1 %vm2588_vm1, %v2178_v27  ;;  %2185 = vmatprep.subr.bf16.mxu0 %v2184_v30 }
 0x233   : > { %v815_v34 = vpop.f32.mrb[7].mxu1  ;;  %2187 = vmatpush3.bf16.msra.mxu0 %v2184_v30  ;;  %v821_v35 = vadd.f32 %v2062_v33, %v1945_v32 }
 0x234   : > { %v816_v36 = vadd.f32 %v1945_v32, %v815_v34 }
 0x235   : > { %v826_v38 = vmul.f32 1.442695, %v821_v35 }
 0x236   : > { %v824_v37 = vmul.f32 1.442695, %v816_v36 }
 0x238   : > { %2336 = vpow2.f32 %v824_v37 }
 0x239   : > { %2068 = vmatmul.mubr.msk.f32.vlgmr.msra.gmra.mrb[8].mxu1 %vm486_vm0, %v2576_v21  ;;  %2338 = vpow2.f32 %v826_v38 }
 0x242   : > { %v2337_v39 = vpop.eup %2336 }
 0x243   : > { %932 = vperm.xlu0 %2286, %v2337_v39   ;;  %921 = vperm.xlu1 %2285, %v2337_v39   ;;  %v2339_v40 = vpop.eup %2338 }
 0x247   : > { %926 = vperm.xlu1 %2285, %v2339_v40  }
 0x24b   : > { %2287 = vset.pattern.permute.xlu1 %v2397_v19 }
 0x24c   : > { %936 = vperm.xlu1 %2287, %v2339_v40  }
 0x296   : > { %v1050_v41 = vpop.permute.xlu1 %1049 }
 0x297   : > { %2081 = vmatprep.mubr.msk.f32.mxu1 %vm486_vm0, %v1050_v41 }
 0x29a   : > { %v1052_v46 = vpop.permute.xlu1 %1051 }
 0x2a3   : > { %v2282_v42 = vpop.permute.xlu0 %2281 }
 0x2a4   : > { %v2284_v43 = vunpack.i.h.bf16 %v2282_v42  ;;  %v2283_v44 = vunpack.i.l.bf16 %v2282_v42 }
 0x2a6   : > { %v2188_v45 = vpack.c.bf16 %v2284_v43, %v2283_v44 }
 0x2a8   : > { %2190 = vmatprep.subr.msk.bf16.mxu1 %vm2588_vm1, %v2188_v45 }
 0x2a9   : > { %2193 = vmatpush3.bf16.xpose.msk.msra.mxu1 %vm2588_vm1, %v2188_v45 }
 0x2b0   : > { %2082 = vmatmul.mubr.msk.f32.vlgmr.msra.gmra.mrb[10].mxu1 %vm486_vm0, %v1052_v46 }
 0x2c2   : > { %v2613_v47 = vpop.permute.xlu1 %921  ;;  %v933_v53 = vpop.permute.xlu0 %932 }
 0x2c3   : > { %v2624_v60 = vmul.f32 %v933_v53, %v828_v52 }
 0x2c6   : > { %v2615_v48 = vpop.permute.xlu1 %926 }
 0x2cb   : > { %v937_v50 = vpop.permute.xlu1 %936 }
 0x2cc   : > { %v2621_v58 = vmul.f32 %v937_v50, %v829_v49 }
 0x30c   : > { %v2069_v51 = vpop.f32.mrb[8].mxu1 }
 0x30d   : > { %v918_v54 = vmul.f32 0.17677669, %v2069_v51  ;;  %v908_v56 = vpop.f32.mrb[9].mxu1 }
 0x30e   : > { %v917_v57 = vmul.f32 0.17677669, %v908_v56 }
 0x30f   : > { %v930_v59 = vmul.f32 %v2615_v48, %v918_v54 }
 0x310   : > { %v929_v61 = vmul.f32 %v2613_v47, %v917_v57 }
 0x311   : > { %v942_v62 = vadd.f32 %v2621_v58, %v930_v59 }
 0x312   : > { %v941_v63 = vadd.f32 %v2624_v60, %v929_v61 }
 0x313   : > { %v947_v0 = vsel %vm943_vm2, %v942_v62, -inf }
 0x314   : > { %948 = vmax.xlane.f32.xlu1 %v947_v0  ;;  %v944_v2 = vsel %vm943_vm2, %v941_v63, -inf }
 0x315   : > { %945 = vmax.xlane.f32.xlu0 %v944_v2 }
 0x383   : > { %v2083_v3 = vpop.f32.mrb[10].mxu1 }
 0x384   : > { %v1141_v4 = vmul.f32 0.17677669, %v2083_v3  ;;  %v1131_v5 = vpop.f32.mrb[11].mxu1 }
 0x385   : > { %v1140_v6 = vmul.f32 0.17677669, %v1131_v5 }
 0x386   : > { %v1143_v7 = vmul.f32 %v1141_v4, %v2615_v48 }
 0x387   : > { %v1142_v8 = vmul.f32 %v1140_v6, %v2613_v47 }
 0x388   : > { %v1145_v11 = vadd.f32 %v1143_v7, %v2621_v58 }
 0x389   : > { %v1144_v9 = vadd.f32 %v1142_v8, %v2624_v60 }
 0x38a   : > { %v1149_v12 = vsel %vm943_vm2, %v1145_v11, -inf }
 0x38b   : > { %v1146_v10 = vsel %vm943_vm2, %v1144_v9, -inf }
 0x38c   : > { %1147 = vmax.xlane.f32.xlu0 %v1146_v10 }
 0x390   : > { %1150 = vmax.xlane.f32.xlu0 %v1149_v12 }
 0x3a1   : > { %v949_v13 = vpop.xlane.xlu1 %948 }
 0x3a2   : > { %v951_v14 = vsub.f32 %v942_v62, %v949_v13  ;;  %v946_v15 = vpop.xlane.xlu0 %945 }
 0x3a3   : > { %v950_v16 = vsub.f32 %v941_v63, %v946_v15 }
 0x3a4   : > { %v954_v17 = vmul.f32 1.442695, %v951_v14 }
 0x3a5   : > { %v952_v18 = vmul.f32 1.442695, %v950_v16 }
 0x3a6   : > { %2340 = vpow2.f32 %v954_v17 }
 0x3a7   : > { %2342 = vpow2.f32 %v952_v18 }
 0x3b0   : > { %v2341_v19 = vpop.eup %2340 }
 0x3b1   : > { %v2343_v20 = vpop.eup %2342  ;;  %v959_v23 = vsel %vm943_vm2, %v2341_v19, 0.0 }
 0x3b2   : > { %960 = vadd.xlane.f32.xlu1 %v959_v23  ;;  %v956_v24 = vsel %vm943_vm2, %v2343_v20, 0.0 }
 0x3b3   : > { %957 = vadd.xlane.f32.xlu0 %v956_v24 }
 0x419   : > { %v1148_v25 = vpop.xlane.xlu0 %1147 }
 0x41a   : > { %v1152_v27 = vsub.f32 %v1144_v9, %v1148_v25 }
 0x41c   : > { %v1154_v28 = vmul.f32 1.442695, %v1152_v27 }
 0x41d   : > { %v1151_v30 = vpop.xlane.xlu0 %1150 }
 0x41e   : > { %2344 = vpow2.f32 %v1154_v28  ;;  %v1153_v32 = vsub.f32 %v1145_v11, %v1151_v30 }
 0x420   : > { %v1156_v33 = vmul.f32 1.442695, %v1153_v32 }
 0x422   : > { %2346 = vpow2.f32 %v1156_v33 }
 0x428   : > { %v2345_v34 = vpop.eup %2344 }
 0x429   : > { %v1158_v35 = vsel %vm943_vm2, %v2345_v34, 0.0 }
 0x42a   : > { %1159 = vadd.xlane.f32.xlu0 %v1158_v35 }
 0x42c   : > { %v2347_v36 = vpop.eup %2346 }
 0x42d   : > { %v1161_v37 = vsel %vm943_vm2, %v2347_v36, 0.0 }
 0x42e   : > { %1162 = vadd.xlane.f32.xlu1 %v1161_v37 }
 0x43f   : > { %2294 = vrot.lane.b32.xlu1 %v2592_v29, %s2400_s25  ;;  %v961_v38 = vpop.xlane.xlu1 %960 }
 0x440   : > { %2348 = vrcp.f32 %v961_v38  ;;  %2289 = vrot.lane.b32.xlu0 %v2594_v31, %s2399_s15  ;;  %v958_v39 = vpop.xlane.xlu0 %957 }
 0x441   : > { %2350 = vrcp.f32 %v958_v39 }
 0x443   : > { %1259 = vrot.lane.b32.xlu1 %v2578_v22, %s2400_s25 }
 0x447   : > { %1261 = vrot.lane.b32.xlu1 %v2576_v21, %s2400_s25 }
 0x44a   : > { %v2349_v40 = vpop.eup %2348 }
 0x44b   : > { %v2351_v41 = vpop.eup %2350  ;;  %v967_v43 = vmul.f32 %v2349_v40, %v2341_v19 }
 0x44c   : > { %v966_v42 = vmul.f32 %v2351_v41, %v2343_v20 }
 0x44e   : > { %2074 = vmatprep.mubr.msk.f32.mxu0 %vm943_vm2, %v966_v42 }
 0x44f   : > { %2075 = vmatmul.mubr.msk.f32.vlgmr.msra.gmra.mrb[0].mxu0 %vm943_vm2, %v967_v43 }
 0x4b7   : > { %v1160_v44 = vpop.xlane.xlu0 %1159 }
 0x4b8   : > { %2352 = vrcp.f32 %v1160_v44 }
 0x4bb   : > { %v2290_v45 = vpop.permute.xlu0 %2289  ;;  %v1163_v46 = vpop.xlane.xlu1 %1162 }
 0x4bc   : > { %v2292_v49 = vunpack.i.h.bf16 %v2290_v45  ;;  %v2291_v50 = vunpack.i.l.bf16 %v2290_v45  ;;  %2354 = vrcp.f32 %v1163_v46 }
 0x4be   : > { %v2194_v51 = vpack.c.bf16 %v2292_v49, %v2291_v50 }
 0x4bf   : > { %v2295_v52 = vpop.permute.xlu1 %2294 }
 0x4c0   : > { %v2297_v53 = vunpack.i.h.bf16 %v2295_v52  ;;  %v2296_v54 = vunpack.i.l.bf16 %v2295_v52  ;;  %2195 = vmatprep.subr.bf16.mxu0 %v2194_v51 }
 0x4c1   : > { %2197 = vmatpush3.bf16.msra.mxu0 %v2194_v51 }
 0x4c2   : > { %v2353_v56 = vpop.eup %2352  ;;  %v2198_v57 = vpack.c.bf16 %v2297_v53, %v2296_v54 }
 0x4c3   : > { %v1168_v59 = vmul.f32 %v2353_v56, %v2345_v34  ;;  %v1260_v63 = vpop.permute.xlu1 %1259 }
 0x4c4   : > { %2200 = vmatprep.subr.msk.bf16.mxu0 %vm2588_vm1, %v2198_v57 }
 0x4c5   : > { %2088 = vmatprep.mubr.msk.f32.mxu0 %vm943_vm2, %v1168_v59 }
 0x4c6   : > { %v2355_v61 = vpop.eup %2354 }
 0x4c7   : > { %v1169_v62 = vmul.f32 %v2355_v61, %v2347_v36  ;;  %v1262_v0 = vpop.permute.xlu1 %1261 }
 0x4c9   : > { %2089 = vmatmul.mubr.msk.f32.vlgmr.msra.gmra.mrb[2].mxu0 %vm943_vm2, %v1169_v62 }
 0x4ca   : > { %2203 = vmatpush3.bf16.xpose.msk.msra.mxu0 %vm2588_vm1, %v2198_v57  ;;  %2095 = vmatprep.mubr.msk.f32.mxu0 %vm486_vm0, %v1260_v63 }
 0x4d1   : > { %2096 = vmatmul.mubr.msk.f32.vlgmr.msra.gmra.mrb[4].mxu0 %vm486_vm0, %v1262_v0 }
 0x522   : > { %v2659_v2 = vpop.f32.mrb[0].mxu0 }
 0x523   : > { %v2661_v3 = vpop.f32.mrb[1].mxu0 }
 0x59c   : > { %v2663_v4 = vpop.f32.mrb[2].mxu0 }
 0x59d   : > { %v2665_v5 = vpop.f32.mrb[3].mxu0 }
 0x59e   : > { %v2313_v6 = vpack.i.bf16 %v2663_v4, %v2665_v5 }
 0x5a4   : > { %v2097_v7 = vpop.f32.mrb[4].mxu0 }
 0x5a5   : > { %v1351_v8 = vmul.f32 0.17677669, %v2097_v7  ;;  %v1341_v9 = vpop.f32.mrb[5].mxu0 }
 0x5a6   : > { %v1350_v10 = vmul.f32 0.17677669, %v1341_v9 }
 0x5a7   : > { %v1353_v11 = vmul.f32 %v1351_v8, %v2615_v48 }
 0x5a8   : > { %v1352_v12 = vmul.f32 %v1350_v10, %v2613_v47 }
 0x5a9   : > { %v1355_v13 = vadd.f32 %v1353_v11, %v2621_v58 }
 0x5aa   : > { %v1354_v14 = vadd.f32 %v1352_v12, %v2624_v60 }
 0x5ab   : > { %v1359_v15 = vsel %vm943_vm2, %v1355_v13, -inf }
 0x5ac   : > { %1360 = vmax.xlane.f32.xlu1 %v1359_v15  ;;  %v1356_v16 = vsel %vm943_vm2, %v1354_v14, -inf }
 0x5ad   : > { %1357 = vmax.xlane.f32.xlu0 %v1356_v16 }
 0x5bd   : > { %2304 = vrot.lane.b32.xlu1 %v2592_v29, %s2401_s26 }
 0x5c1   : > { %1467 = vrot.lane.b32.xlu1 %v2578_v22, %s2401_s26 }
 0x5c5   : > { %1469 = vrot.lane.b32.xlu1 %v2576_v21, %s2401_s26 }
 0x639   : > { %v1361_v17 = vpop.xlane.xlu1 %1360 }
 0x63a   : > { %v1363_v18 = vsub.f32 %v1355_v13, %v1361_v17  ;;  %v1358_v19 = vpop.xlane.xlu0 %1357  ;;  %v1708_v17 = vld [vmem:[%s2792_s9 + $0x8] sm:$0xff] }
 0x63b   : > { %v1362_v20 = vsub.f32 %v1354_v14, %v1358_v19 }
 0x63c   : > { %v1366_v23 = vmul.f32 1.442695, %v1363_v18  ;;  %v1709_v18 = vld [vmem:[%s2792_s9 + $0x10] sm:$0xff] }
 0x63d   : > { %v1364_v24 = vmul.f32 1.442695, %v1362_v20  ;;  %v2305_v30 = vpop.permute.xlu1 %2304  ;;  %v1710_v20 = vld [vmem:[%s2792_s9 + $0x18] sm:$0xff] }
 0x63e   : > { %2356 = vpow2.f32 %v1366_v23  ;;  %v2307_v33 = vunpack.i.h.bf16 %v2305_v30  ;;  %v2306_v34 = vunpack.i.l.bf16 %v2305_v30  ;;  %v2222_v23 = vpack.c.bf16 %v1710_v20, %v1709_v18  ;;  %v1716_v30 = vld [vmem:[%s2792_s9 + $0x48] sm:$0xff] }
 0x63f   : > { %2358 = vpow2.f32 %v1364_v24  ;;  %v1711_v24 = vld [vmem:[%s2792_s9 + $0x20] sm:$0xff] }
 0x640   : > { %v2208_v38 = vpack.c.bf16 %v2307_v33, %v2306_v34  ;;  %v1717_v33 = vld [vmem:[%s2792_s9 + $0x50] sm:$0xff]  ;;  %v1718_v34 = vld [vmem:[%s2792_s9 + $0x58] sm:$0xff] }
 0x641   : > { %v1468_v43 = vpop.permute.xlu1 %1467 }
 0x645   : > { %v1470_v44 = vpop.permute.xlu1 %1469 }
 0x648   : > { %v2357_v25 = vpop.eup %2356 }
 0x649   : > { %v1371_v27 = vsel %vm943_vm2, %v2357_v25, 0.0  ;;  %v2359_v28 = vpop.eup %2358 }
 0x64a   : > { %1372 = vadd.xlane.f32.xlu0 %v1371_v27  ;;  %v1368_v29 = vsel %vm943_vm2, %v2359_v28, 0.0 }
 0x64e   : > { %1369 = vadd.xlane.f32.xlu0 %v1368_v29  ;;  %v1714_v29 = vld [vmem:[%s2792_s9 + $0x38] sm:$0xff] }
 0x664   : > { %2299 = vrot.lane.b32.xlu0 %v2594_v31, %s2400_s25 }
 0x6d7   : > { %v1373_v21 = vpop.xlane.xlu0 %1372 }
 0x6d8   : > { %2360 = vrcp.f32 %v1373_v21 }
 0x6db   : > { %v1370_v22 = vpop.xlane.xlu0 %1369 }
 0x6dc   : > { %2362 = vrcp.f32 %v1370_v22  ;;  %v1715_v22 = vld [vmem:[%s2792_s9 + $0x40] sm:$0xff] }
 0x6df   : > { %v2300_v32 = vpop.permute.xlu0 %2299 }
 0x6e0   : > { %v2302_v35 = vunpack.i.h.bf16 %v2300_v32  ;;  %v2301_v36 = vunpack.i.l.bf16 %v2300_v32  ;;  %v2234_v32 = vpack.c.bf16 %v1716_v30, %v1715_v22 }
 0x6e2   : > { %v2204_v37 = vpack.c.bf16 %v2302_v35, %v2301_v36  ;;  %v2361_v39 = vpop.eup %2360  ;;  %v2238_v35 = vpack.c.bf16 %v1718_v34, %v1717_v33  ;;  %v1719_v36 = vld [vmem:[%s2792_s9 + $0x60] sm:$0xff] }
 0x6e3   : > { %v1379_v42 = vmul.f32 %v2361_v39, %v2357_v25  ;;  %v1712_v25 = vld [vmem:[%s2792_s9 + $0x28] sm:$0xff]  ;;  %v1721_v39 = vld [vmem:[%s2792_s9 + $0x70] sm:$0xff] }
 0x6e4   : > { %2205 = vmatprep.subr.bf16.mxu1 %v2204_v37  ;;  %v2226_v27 = vpack.c.bf16 %v1712_v25, %v1711_v24 }
 0x6e5   : > { %2207 = vmatpush3.bf16.msra.mxu1 %v2204_v37  ;;  %v1720_v37 = vld [vmem:[%s2792_s9 + $0x68] sm:$0xff] }
 0x6e6   : > { %v2363_v40 = vpop.eup %2362  ;;  %2210 = vmatprep.subr.msk.bf16.mxu1 %vm2588_vm1, %v2208_v38 }
 0x6e7   : > { %v1378_v41 = vmul.f32 %v2363_v40, %v2359_v28  ;;  %v1713_v28 = vld [vmem:[%s2792_s9 + $0x30] sm:$0xff]  ;;  %v1722_v40 = vld [vmem:[%s2792_s9 + $0x78] sm:$0xff] }
 0x6e8   : > { %v2230_v21 = vpack.c.bf16 %v1714_v29, %v1713_v28 }
 0x6e9   : > { %2102 = vmatprep.mubr.msk.f32.mxu1 %vm943_vm2, %v1378_v41  ;;  %v2246_v41 = vpack.c.bf16 %v1722_v40, %v1721_v39 }
 0x6ea   : > { %2103 = vmatmul.mubr.msk.f32.vlgmr.msra.gmra.mrb[12].mxu1 %vm943_vm2, %v1379_v42 }
 0x6eb   : > { %2109 = vmatprep.mubr.msk.f32.mxu1 %vm486_vm0, %v1468_v43 }
 0x6ee   : > { %2213 = vmatpush3.bf16.xpose.msk.msra.mxu1 %vm2588_vm1, %v2208_v38  ;;  %v2242_v38 = vpack.c.bf16 %v1720_v37, %v1719_v36 }
 0x6f5   : > { %2110 = vmatmul.mubr.msk.f32.vlgmr.msra.gmra.mrb[14].mxu1 %vm486_vm0, %v1470_v44 }
 0x7bd   : > { %v2104_v45 = vpop.f32.mrb[12].mxu1 }
 0x7be   : > { %v1458_v46 = vpop.f32.mrb[13].mxu1 }
 0x7bf   : > { %v2318_v49 = vpack.i.bf16 %v2104_v45, %v1458_v46 }
 0x7c8   : > { %v2111_v50 = vpop.f32.mrb[14].mxu1 }
 0x7c9   : > { %v1559_v51 = vmul.f32 0.17677669, %v2111_v50  ;;  %v1549_v52 = vpop.f32.mrb[15].mxu1 }
 0x7ca   : > { %v1558_v53 = vmul.f32 0.17677669, %v1549_v52 }
 0x7cb   : > { %v1561_v54 = vmul.f32 %v1559_v51, %v2615_v48 }
 0x7cc   : > { %v1560_v56 = vmul.f32 %v1558_v53, %v2613_v47 }
 0x7cd   : > { %v1563_v57 = vadd.f32 %v1561_v54, %v2621_v58 }
 0x7ce   : > { %v1562_v59 = vadd.f32 %v1560_v56, %v2624_v60 }
 0x7cf   : > { %v1567_v26 = vsel %vm943_vm2, %v1563_v57, -inf }
 0x7d0   : > { %1568 = vmax.xlane.f32.xlu1 %v1567_v26  ;;  %v1564_v61 = vsel %vm943_vm2, %v1562_v59, -inf }
 0x7d1   : > { %1565 = vmax.xlane.f32.xlu0 %v1564_v61 }
 0x7e1   : > { %2314 = vrot.lane.b32.xlu1 %v2313_v6, %s2401_s26 }
 0x7e5   : > { %2319 = vrot.lane.b32.xlu1 %v2318_v49, %s2400_s25 }
 0x85d   : > { %v1569_v48 = vpop.xlane.xlu1 %1568 }
 0x85e   : > { %v1571_v62 = vsub.f32 %v1563_v57, %v1569_v48  ;;  %v1566_v47 = vpop.xlane.xlu0 %1565 }
 0x85f   : > { %v1570_v63 = vsub.f32 %v1562_v59, %v1566_v47  ;;  %v1972_v47 = vld [vmem:[%s2793_s10] ss:$0 sm:$0xff] }
 0x860   : > { %v1574_v58 = vmul.f32 1.442695, %v1571_v62 }
 0x861   : > { %v1572_v0 = vmul.f32 1.442695, %v1570_v63  ;;  %v2315_v45 = vpop.permute.xlu1 %2314 }
 0x862   : > { %2364 = vpow2.f32 %v1574_v58  ;;  %v2317_v49 = vunpack.i.h.bf16 %v2315_v45  ;;  %v2316_v50 = vunpack.i.l.bf16 %v2315_v45 }
 0x863   : > { %2366 = vpow2.f32 %v1572_v0 }
 0x864   : > { %v1700_v54 = vsel %vm486_vm0, %v2659_v2, %v2317_v49  ;;  %v1699_v59 = vsel %vm486_vm0, %v2661_v3, %v2316_v50 }
 0x865   : > { %v2320_v46 = vpop.permute.xlu1 %2319 }
 0x866   : > { %v2322_v51 = vunpack.i.h.bf16 %v2320_v46  ;;  %v2321_v52 = vunpack.i.l.bf16 %v2320_v46 }
 0x868   : > { %v1702_v26 = vsel %vm1701_vm3, %v1699_v59, %v2321_v52  ;;  %v1703_v61 = vsel %vm1701_vm3, %v1700_v54, %v2322_v51 }
 0x86c   : > { %v2365_v60 = vpop.eup %2364 }
 0x86d   : > { %v1579_v7 = vsel %vm943_vm2, %v2365_v60, 0.0  ;;  %v2367_v8 = vpop.eup %2366 }
 0x86e   : > { %1580 = vadd.xlane.f32.xlu0 %v1579_v7  ;;  %v1576_v9 = vsel %vm943_vm2, %v2367_v8, 0.0 }
 0x872   : > { %1577 = vadd.xlane.f32.xlu0 %v1576_v9 }
 0x888   : > { %2309 = vrot.lane.b32.xlu0 %v2594_v31, %s2401_s26  ;;  %v1707_v31 = vld [vmem:[%s2792_s9] sm:$0xff] }
 0x889   : > { %v2218_v19 = vpack.c.bf16 %v1708_v17, %v1707_v31 }
 0x8fb   : > { %v1581_v4 = vpop.xlane.xlu0 %1580 }
 0x8fc   : > { %2368 = vrcp.f32 %v1581_v4 }
 0x8ff   : > { %v1578_v5 = vpop.xlane.xlu0 %1577 }
 0x900   : > { %2370 = vrcp.f32 %v1578_v5 }
 0x903   : > { %v2310_v6 = vpop.permute.xlu0 %2309 }
 0x904   : > { %v2312_v10 = vunpack.i.h.bf16 %v2310_v6  ;;  %v2311_v11 = vunpack.i.l.bf16 %v2310_v6 }
 0x906   : > { %v2214_v12 = vpack.c.bf16 %v2312_v10, %v2311_v11  ;;  %v2369_v13 = vpop.eup %2368 }
 0x907   : > { %v1587_v16 = vmul.f32 %v2369_v13, %v2365_v60 }
 0x908   : > { %2215 = vmatprep.subr.bf16.mxu0 %v2214_v12 }
 0x909   : > { %2217 = vmatpush3.bf16.msra.mxu0 %v2214_v12 }
 0x90a   : > { %v2371_v14 = vpop.eup %2370  ;;  %2219 = vmatprep.subr.bf16.mxu0 %v2218_v19 }
 0x90b   : > { %v1586_v15 = vmul.f32 %v2371_v14, %v2367_v8 }
 0x90d   : > { %2116 = vmatprep.mubr.msk.f32.mxu0 %vm943_vm2, %v1586_v15 }
 0x90e   : > { %2117 = vmatmul.mubr.msk.f32.vlgmr.msra.gmra.mrb[6].mxu0 %vm943_vm2, %v1587_v16 }
 0x90f   : > { %2221 = vmatpush3.bf16.msra.mxu0 %v2218_v19 }
 0x910   : > { %2223 = vmatprep.subr.bf16.mxu0 %v2222_v23 }
 0x913   : > { %2225 = vmatpush3.bf16.msra.mxu0 %v2222_v23 }
 0x914   : > { %2227 = vmatprep.subr.bf16.mxu0 %v2226_v27 }
 0x917   : > { %2229 = vmatpush3.bf16.msra.mxu0 %v2226_v27 }
 0x918   : > { %2231 = vmatprep.subr.bf16.mxu0 %v2230_v21 }
 0x91b   : > { %2233 = vmatpush3.bf16.msra.mxu0 %v2230_v21 }
 0x91c   : > { %2235 = vmatprep.subr.bf16.mxu0 %v2234_v32 }
 0x91f   : > { %2237 = vmatpush3.bf16.msra.mxu0 %v2234_v32 }
 0x920   : > { %2239 = vmatprep.subr.bf16.mxu0 %v2238_v35 }
 0x923   : > { %2241 = vmatpush3.bf16.msra.mxu0 %v2238_v35 }
 0x924   : > { %2243 = vmatprep.subr.bf16.mxu0 %v2242_v38 }
 0x927   : > { %2245 = vmatpush3.bf16.msra.mxu0 %v2242_v38 }
 0x928   : > { %2247 = vmatprep.subr.bf16.mxu0 %v2246_v41 }
 0x92b   : > { %2249 = vmatpush3.bf16.msra.mxu0 %v2246_v41 }
 0x9e1   : > { %v2118_v42 = vpop.f32.mrb[6].mxu0 }
 0x9e2   : > { %v1666_v43 = vpop.f32.mrb[7].mxu0 }
 0x9e3   : > { %v2323_v44 = vpack.i.bf16 %v2118_v42, %v1666_v43 }
 0x9e5   : > { %2324 = vrot.lane.b32.xlu1 %v2323_v44, %s2399_s15 }
 0xa57   : > { %v2325_v53 = vpop.permute.xlu1 %2324 }
 0xa58   : > { %v2327_v56 = vunpack.i.h.bf16 %v2325_v53  ;;  %v2326_v57 = vunpack.i.l.bf16 %v2325_v53 }
 0xa5a   : > { %v1705_v48 = vsel %vm1704_vm4, %v1702_v26, %v2326_v57  ;;  %v1706_v62 = vsel %vm1704_vm4, %v1703_v61, %v2327_v56 }
 0xa5b   : > { %2151 = vmatprep.mubr.f32.mxu0 %v1705_v48 }
 0xa5c   : > { %2152 = vmatmul.mubr.f32.vlgmr.msra.gmra.mrb[8].mxu0 %v1706_v62 }
 0xb2f   : > { %v2153_v63 = vpop.f32.mrb[8].mxu0 }
 0xb30   : > { %v1802_v58 = vadd.f32 %v2153_v63, %v1972_v47  ;;  %v1796_v0 = vpop.f32.mrb[9].mxu0 }
 0xb31   : > { %v1797_v2 = vadd.f32 %v1972_v47, %v1796_v0 }
 0xb32   : > { %v1806_v3 = vadd.f32 %v1802_v58, %v2547_v1 }
 0xb33   : > { %v1805_v60 = vadd.f32 %v1797_v2, %v2530_v55 }
 0xb34   : > { %1808 = vst.msk [vmem:[%s480_s16 + $0x8] sm:$0xff] %vm486_vm0, %v1806_v3 }
 0xb35   : > { %1807 = vst.msk [vmem:[%s480_s16] sm:$0xff] %vm486_vm0, %v1805_v60 }
 0xb36 PF: > { %s21_s19 = sadd.s32 1, %s2394_s19   ;;  %s2797_s17 = smov %s2390_s18 }
 0xb37   : > { %p18_p5 = scmp.ge.s32.totalorder %s21_s19, 4   ;;  %s2798_s18 = smov %s2800_s20 }
 0xb39   :  { %20 = sbr.rel (!%p18_p5) target bundleno = 2 (0x2), region = 100 }

// kernel: attention_block_forward.3
= control target key start
LH: loop header
LB: loop body
LE: loop exit
PB: predicated region body
PF: predicated region fallthrough
CT: control target
= control target key end

     0   :  { %vm52_vm0 = vcmask 261120   ;;  %s1280_s0 = inlined_call_operand.vmem [shape: f32[32,32], index: 0, kind: input, shape index: {}]   ;;  %s1281_s1 = inlined_call_operand.vmem [shape: f32[32,32], index: 1, kind: input, shape index: {}]   ;;  %s1282_s2 = inlined_call_operand.vmem [shape: f32[1,32], index: 2, kind: input, shape index: {}]   ;;  %s1283_s3 = inlined_call_operand.vmem [shape: f32[1,32], index: 3, kind: input, shape index: {}]   ;;  %s1284_s4 = inlined_call_operand.vmem [shape: f32[32,128], index: 4, kind: input, shape index: {}]   ;;  %s1285_s5 = inlined_call_operand.vmem [shape: f32[1,128], index: 5, kind: input, shape index: {}]   ;;  %s1286_s6 = inlined_call_operand.vmem [shape: f32[128,32], index: 6, kind: input, shape index: {}]   ;;  %s1287_s7 = inlined_call_operand.vmem [shape: f32[1,32], index: 7, kind: input, shape index: {}]   ;;  %s1288_s8 = inlined_call_operand.vmem [shape: f32[32,64], index: 8, kind: input, shape index: {}]   ;;  %s1289_s9 = inlined_call_operand.vmem [shape: f32[1,64], index: 9, kind: input, shape index: {}]   ;;  %s1290_s10 = inlined_call_operand.vmem [shape: f32[64,32], index: 10, kind: input, shape index: {}]   ;;  %s1291_s11 = inlined_call_operand.vmem [shape: f32[1,32], index: 11, kind: input, shape index: {}]   ;;  %s1292_s12 = inlined_call_operand.<no memory space> [shape: f32[1], index: 12, kind: input, shape index: {}]   ;;  %s1293_s13 = inlined_call_operand.hbm [shape: f32[32,32], index: 13, kind: output, shape index: {}]  }
   0x1   :  { %v46_v0 = vld [vmem:[%s1280_s0] sm:$0xff]  ;;  %v48_v1 = vld [vmem:[%s1280_s0 + $0x10] sm:$0xff]  ;;  %v47_v2 = vld [vmem:[%s1280_s0 + $0x8] sm:$0xff] }
   0x2   :  { %v53_v3 = vsel %vm52_vm0, %v46_v0, 0.0  ;;  %v59_v4 = vsel %vm52_vm0, %v48_v1, 0.0  ;;  %v49_v5 = vld [vmem:[%s1280_s0 + $0x18] sm:$0xff] }
   0x3   :  { %19 = vsyncpa [#allocation4], 0  ;;  %54 = vadd.xlane.f32.xlu0 %v53_v3  ;;  %60 = vadd.xlane.f32.xlu1 %v59_v4  ;;  %v56_v6 = vsel %vm52_vm0, %v47_v2, 0.0  ;;  %v62_v7 = vsel %vm52_vm0, %v49_v5, 0.0  ;;  %v126_v28 = vld [vmem:[%s1284_s4] sm:$0xff]  ;;  %v127_v29 = vld [vmem:[%s1284_s4 + $0x8] sm:$0xff] }
   0x4   :  { %v128_v30 = vld [vmem:[%s1284_s4 + $0x10] sm:$0xff]  ;;  %v867_v31 = vpack.c.bf16 %v127_v29, %v126_v28  ;;  %v129_v32 = vld [vmem:[%s1284_s4 + $0x18] sm:$0xff]  ;;  %v458_v34 = vld [vmem:[%s1288_s8] sm:$0xff]  ;;  %vm585_vm1 = vcmask 523264  }
   0x5   :  { %v871_v33 = vpack.c.bf16 %v129_v32, %v128_v30  ;;  %v459_v35 = vld [vmem:[%s1288_s8 + $0x8] sm:$0xff]  ;;  %v713_v50 = vld [vmem:[%s1282_s2] ss:$0 sm:$0xff]  ;;  %v460_v59 = vld [vmem:[%s1288_s8 + $0x10] sm:$0xff] }
   0x6   :  { %868 = vmatprep.subr.bf16.mxu0 %v867_v31  ;;  %v907_v36 = vpack.c.bf16 %v459_v35, %v458_v34  ;;  %v714_v52 = vld [vmem:[%s1283_s3] ss:$0 sm:$0xff]  ;;  %v461_v60 = vld [vmem:[%s1288_s8 + $0x18] sm:$0xff]  ;;  %v351_v34 = vld [vmem:[%s1286_s6 + $0x48] sm:$0xff] }
   0x7   :  { %57 = vadd.xlane.f32.xlu0 %v56_v6  ;;  %63 = vadd.xlane.f32.xlu1 %v62_v7  ;;  %v454_v6 = vld [vmem:[%s1281_s1] sm:$0xff]  ;;  %v455_v7 = vld [vmem:[%s1281_s1 + $0x8] sm:$0xff]  ;;  %v349_v28 = vld [vmem:[%s1286_s6 + $0x38] sm:$0xff] }
   0x8   :  { %870 = vmatpush3.bf16.msra.mxu0 %v867_v31  ;;  %v576_v31 = vld [vmem:[%s1290_s10 + $0x30] sm:$0xff]  ;;  %v577_v32 = vld [vmem:[%s1290_s10 + $0x38] sm:$0xff] }
   0x9   :  { %872 = vmatprep.subr.bf16.mxu0 %v871_v33  ;;  %v927_v35 = vpack.c.bf16 %v577_v32, %v576_v31 }
   0xc   :  { %874 = vmatpush3.bf16.msra.mxu0 %v871_v33  ;;  %v350_v33 = vld [vmem:[%s1286_s6 + $0x40] sm:$0xff] }
   0xd   :  { %908 = vmatprep.subr.bf16.mxu0 %v907_v36 }
  0x90   :  { %v55_v8 = vpop.xlane.xlu0 %54  ;;  %v61_v9 = vpop.xlane.xlu1 %60 }
  0x91   :  { %v66_v10 = vmul.f32 0.03125, %v55_v8  ;;  %v68_v11 = vmul.f32 0.03125, %v61_v9  ;;  %v456_v8 = vld [vmem:[%s1281_s1 + $0x10] sm:$0xff]  ;;  %v457_v9 = vld [vmem:[%s1281_s1 + $0x18] sm:$0xff] }
  0x93   :  { %v70_v12 = vsub.f32 %v46_v0, %v66_v10  ;;  %v72_v13 = vsub.f32 %v48_v1, %v68_v11  ;;  %v342_v10 = vld [vmem:[%s1286_s6] sm:$0xff]  ;;  %v343_v11 = vld [vmem:[%s1286_s6 + $0x8] sm:$0xff] }
  0x94   :  { %v58_v14 = vpop.xlane.xlu0 %57  ;;  %v64_v15 = vpop.xlane.xlu1 %63 }
  0x95   :  { %v67_v16 = vmul.f32 0.03125, %v58_v14  ;;  %v69_v17 = vmul.f32 0.03125, %v64_v15  ;;  %v74_v18 = vmul.f32 %v70_v12, %v70_v12  ;;  %v76_v19 = vmul.f32 %v72_v13, %v72_v13  ;;  %v345_v14 = vld [vmem:[%s1286_s6 + $0x18] sm:$0xff] }
  0x97   :  { %v71_v20 = vsub.f32 %v47_v2, %v67_v16  ;;  %v73_v21 = vsub.f32 %v49_v5, %v69_v17  ;;  %v78_v22 = vsel %vm52_vm0, %v74_v18, 0.0  ;;  %v84_v23 = vsel %vm52_vm0, %v76_v19, 0.0  ;;  %v346_v16 = vld [vmem:[%s1286_s6 + $0x20] sm:$0xff]  ;;  %v347_v17 = vld [vmem:[%s1286_s6 + $0x28] sm:$0xff] }
  0x98   :  { %79 = vadd.xlane.f32.xlu0 %v78_v22  ;;  %v911_v2 = vpack.c.bf16 %v461_v60, %v460_v59  ;;  %v570_v18 = vld [vmem:[%s1290_s10] sm:$0xff]  ;;  %v571_v19 = vld [vmem:[%s1290_s10 + $0x8] sm:$0xff]  ;;  %v573_v22 = vld [vmem:[%s1290_s10 + $0x18] sm:$0xff] }
  0x99   :  { %v75_v24 = vmul.f32 %v71_v20, %v71_v20  ;;  %v77_v25 = vmul.f32 %v73_v21, %v73_v21 }
  0x9b   :  { %v81_v26 = vsel %vm52_vm0, %v75_v24, 0.0  ;;  %v87_v27 = vsel %vm52_vm0, %v77_v25, 0.0  ;;  %v574_v25 = vld [vmem:[%s1290_s10 + $0x20] sm:$0xff] }
  0x9c   :  { %85 = vadd.xlane.f32.xlu0 %v84_v23  ;;  %82 = vadd.xlane.f32.xlu1 %v81_v26  ;;  %v883_v23 = vpack.c.bf16 %v347_v17, %v346_v16  ;;  %v575_v26 = vld [vmem:[%s1290_s10 + $0x28] sm:$0xff] }
  0x9d   :  { %v923_v29 = vpack.c.bf16 %v575_v26, %v574_v25 }
  0xa0   :  { %88 = vadd.xlane.f32.xlu1 %v87_v27  ;;  %v348_v27 = vld [vmem:[%s1286_s6 + $0x30] sm:$0xff] }
  0xa1   :  { %v887_v30 = vpack.c.bf16 %v349_v28, %v348_v27 }
 0x125   :  { %v80_v37 = vpop.xlane.xlu0 %79 }
 0x126   :  { %v90_v38 = vmul.f32 0.03125, %v80_v37  ;;  %v352_v37 = vld [vmem:[%s1286_s6 + $0x50] sm:$0xff] }
 0x128   :  { %v94_v39 = vadd.f32 1e-05, %v90_v38  ;;  %v353_v38 = vld [vmem:[%s1286_s6 + $0x58] sm:$0xff] }
 0x129   :  { %v83_v40 = vpop.xlane.xlu1 %82  ;;  %v86_v41 = vpop.xlane.xlu0 %85 }
 0x12a   :  { %934 = vrsqrt.f32 %v94_v39  ;;  %v91_v42 = vmul.f32 0.03125, %v83_v40  ;;  %v92_v43 = vmul.f32 0.03125, %v86_v41  ;;  %v895_v39 = vpack.c.bf16 %v353_v38, %v352_v37  ;;  %v354_v40 = vld [vmem:[%s1286_s6 + $0x60] sm:$0xff]  ;;  %v355_v41 = vld [vmem:[%s1286_s6 + $0x68] sm:$0xff] }
 0x12c   :  { %v95_v44 = vadd.f32 1e-05, %v91_v42  ;;  %v96_v45 = vadd.f32 1e-05, %v92_v43  ;;  %v899_v42 = vpack.c.bf16 %v355_v41, %v354_v40  ;;  %v356_v43 = vld [vmem:[%s1286_s6 + $0x70] sm:$0xff] }
 0x12d   :  { %v89_v46 = vpop.xlane.xlu1 %88 }
 0x12e   :  { %936 = vrsqrt.f32 %v95_v44  ;;  %v93_v47 = vmul.f32 0.03125, %v89_v46  ;;  %v357_v44 = vld [vmem:[%s1286_s6 + $0x78] sm:$0xff]  ;;  %v715_v46 = vld [vmem:[%s1285_s5] ss:$0 sm:$0xff] }
 0x12f   :  { %938 = vrsqrt.f32 %v96_v45  ;;  %v903_v45 = vpack.c.bf16 %v357_v44, %v356_v43 }
 0x130   :  { %v97_v48 = vadd.f32 1e-05, %v93_v47 }
 0x132   :  { %940 = vrsqrt.f32 %v97_v48 }
 0x134   :  { %v935_v49 = vpop.eup %934 }
 0x135   :  { %v102_v51 = vmul.f32 %v935_v49, %v70_v12  ;;  %v344_v12 = vld [vmem:[%s1286_s6 + $0x10] sm:$0xff] }
 0x136   :  { %v879_v15 = vpack.c.bf16 %v345_v14, %v344_v12 }
 0x137   :  { %v112_v53 = vmul.f32 %v713_v50, %v102_v51 }
 0x138   :  { %v937_v54 = vpop.eup %936 }
 0x139   :  { %v939_v55 = vpop.eup %938  ;;  %v1099_v56 = vadd.f32 %v714_v52, %v112_v53  ;;  %v103_v57 = vmul.f32 %v937_v54, %v71_v20  ;;  %v915_v20 = vpack.c.bf16 %v571_v19, %v570_v18 }
 0x13a   :  { %v104_v58 = vmul.f32 %v939_v55, %v72_v13  ;;  %v875_v13 = vpack.c.bf16 %v343_v11, %v342_v10 }
 0x13b   :  { %787 = vmatprep.mubr.msk.f32.mxu0 %vm52_vm0, %v1099_v56  ;;  %v113_v61 = vmul.f32 %v713_v50, %v103_v57 }
 0x13c   :  { %v941_v62 = vpop.eup %940  ;;  %v114_v63 = vmul.f32 %v713_v50, %v104_v58  ;;  %876 = vmatprep.subr.bf16.mxu1 %v875_v13 }
 0x13d   :  { %v1109_v0 = vadd.f32 %v714_v52, %v113_v61  ;;  %v105_v1 = vmul.f32 %v941_v62, %v73_v21  ;;  %878 = vmatpush3.bf16.msra.mxu1 %v875_v13  ;;  %v572_v21 = vld [vmem:[%s1290_s10 + $0x10] sm:$0xff] }
 0x13e   :  { %v1111_v3 = vadd.f32 %v714_v52, %v114_v63  ;;  %880 = vmatprep.subr.bf16.mxu1 %v879_v15  ;;  %v919_v24 = vpack.c.bf16 %v573_v22, %v572_v21 }
 0x13f   :  { %788 = vmatmul.mubr.msk.f32.vlgmr.msra.gmra.mrb[0].mxu0 %vm52_vm0, %v1109_v0  ;;  %v115_v4 = vmul.f32 %v713_v50, %v105_v1 }
 0x140   :  { %790 = vmatprep.mubr.msk.f32.mxu0 %vm52_vm0, %v1111_v3  ;;  %910 = vmatpush3.bf16.msra.mxu0 %v907_v36  ;;  %v891_v36 = vpack.c.bf16 %v351_v34, %v350_v33 }
 0x141   :  { %v1117_v5 = vadd.f32 %v714_v52, %v115_v4  ;;  %912 = vmatprep.subr.bf16.mxu0 %v911_v2  ;;  %882 = vmatpush3.bf16.msra.mxu1 %v879_v15 }
 0x142   :  { %884 = vmatprep.subr.bf16.mxu1 %v883_v23 }
 0x143   :  { %791 = vmatmul.mubr.msk.f32.gmra.mrb[2].mxu0 %vm52_vm0, %v1117_v5 }
 0x144   :  { %914 = vmatpush3.bf16.msra.mxu0 %v911_v2  ;;  %839 = vmatprep.mubr.msk.f32.mxu0 %vm52_vm0, %v454_v6 }
 0x145   :  { %916 = vmatprep.subr.bf16.mxu0 %v915_v20  ;;  %886 = vmatpush3.bf16.msra.mxu1 %v883_v23 }
 0x146   :  { %888 = vmatprep.subr.bf16.mxu1 %v887_v30 }
 0x147   :  { %840 = vmatmul.mubr.msk.f32.vlgmr.msra.gmra.mrb[4].mxu0 %vm52_vm0, %v455_v7 }
 0x148   :  { %842 = vmatprep.mubr.msk.f32.mxu0 %vm52_vm0, %v456_v8  ;;  %918 = vmatpush3.bf16.msra.mxu0 %v915_v20  ;;  %v721_v8 = vld [vmem:[%s1289_s9] ss:$0 sm:$0xff] }
 0x149   :  { %920 = vmatprep.subr.bf16.mxu0 %v919_v24  ;;  %890 = vmatpush3.bf16.msra.mxu1 %v887_v30 }
 0x14a   :  { %892 = vmatprep.subr.bf16.mxu1 %v891_v36 }
 0x14b   :  { %843 = vmatmul.mubr.msk.f32.gmra.mrb[6].mxu0 %vm52_vm0, %v457_v9 }
 0x14c   :  { %922 = vmatpush3.bf16.msra.mxu0 %v919_v24 }
 0x14d   :  { %924 = vmatprep.subr.bf16.mxu0 %v923_v29  ;;  %894 = vmatpush3.bf16.msra.mxu1 %v891_v36 }
 0x14e   :  { %896 = vmatprep.subr.bf16.mxu1 %v895_v39 }
 0x150   :  { %926 = vmatpush3.bf16.msra.mxu0 %v923_v29 }
 0x151   :  { %928 = vmatprep.subr.bf16.mxu0 %v927_v35  ;;  %898 = vmatpush3.bf16.msra.mxu1 %v895_v39 }
 0x152   :  { %900 = vmatprep.subr.bf16.mxu1 %v899_v42 }
 0x154   :  { %930 = vmatpush3.bf16.msra.mxu0 %v927_v35 }
 0x155   :  { %902 = vmatpush3.bf16.msra.mxu1 %v899_v42 }
 0x156   :  { %904 = vmatprep.subr.bf16.mxu1 %v903_v45 }
 0x159   :  { %906 = vmatpush3.bf16.msra.mxu1 %v903_v45 }
 0x212   :  { %v789_v47 = vpop.f32.mrb[0].mxu0 }
 0x213   :  { %v1212_v48 = vadd.f32 %v789_v47, %v715_v46  ;;  %v215_v49 = vpop.f32.mrb[1].mxu0 }
 0x214   :  { %v1214_v50 = vadd.f32 %v715_v46, %v215_v49 }
 0x215   :  { %v1217_v51 = vmul.f32 0.70710677, %v1212_v48 }
 0x216   :  { %v1220_v52 = vmul.f32 0.70710677, %v1214_v50  ;;  %v792_v53 = vpop.f32.mrb[2].mxu0 }
 0x217   :  { %v243_v54 = vand.u32 2147483647, %v1217_v51  ;;  %v1223_v55 = vadd.f32 %v792_v53, %v715_v46  ;;  %v225_v57 = vpop.f32.mrb[3].mxu0  ;;  %vm323_vm2 = vcmp.lt.f32.partialorder %v1217_v51, 0.0 }
 0x218   :  { %v242_v58 = vand.u32 2147483647, %v1220_v52  ;;  %v1226_v59 = vadd.f32 %v715_v46, %v225_v57  ;;  %vm322_vm3 = vcmp.lt.f32.partialorder %v1220_v52, 0.0 }
 0x219   :  { %v247_v60 = vmul.f32 0.3275911, %v243_v54  ;;  %v1229_v61 = vmul.f32 0.70710677, %v1223_v55  ;;  %v299_v22 = vsub.f32 0.0, %v243_v54 }
 0x21a   :  { %v246_v62 = vmul.f32 0.3275911, %v242_v58  ;;  %v1232_v63 = vmul.f32 0.70710677, %v1226_v59  ;;  %v841_v4 = vpop.f32.mrb[4].mxu0  ;;  %v298_v23 = vsub.f32 0.0, %v242_v58 }
 0x21b   :  { %v251_v1 = vadd.f32 1.0, %v247_v60  ;;  %v245_v2 = vand.u32 2147483647, %v1229_v61  ;;  %v547_v9 = vpop.f32.mrb[5].mxu0  ;;  %v553_v14 = vadd.f32 %v841_v4, %v721_v8  ;;  %v303_v27 = vmul.f32 %v299_v22, %v243_v54 }
 0x21c   :  { %v250_v6 = vadd.f32 1.0, %v246_v62  ;;  %v244_v7 = vand.u32 2147483647, %v1232_v63  ;;  %v548_v17 = vadd.f32 %v721_v8, %v547_v9  ;;  %v302_v30 = vmul.f32 %v298_v23, %v242_v58 }
 0x21d   :  { %942 = vrcp.f32 %v251_v1  ;;  %v249_v10 = vmul.f32 0.3275911, %v245_v2  ;;  %v567_v18 = vmax.f32 %v553_v14, 0.0  ;;  %v301_v28 = vsub.f32 0.0, %v245_v2 }
 0x21e   :  { %944 = vrcp.f32 %v250_v6  ;;  %v248_v11 = vmul.f32 0.3275911, %v244_v7  ;;  %v844_v12 = vpop.f32.mrb[6].mxu0  ;;  %v566_v20 = vmax.f32 %v548_v17, 0.0  ;;  %v300_v31 = vsub.f32 0.0, %v244_v7 }
 0x21f   :  { %v253_v13 = vadd.f32 1.0, %v249_v10  ;;  %v557_v15 = vpop.f32.mrb[7].mxu0  ;;  %v563_v19 = vadd.f32 %v844_v12, %v721_v8  ;;  %v308_v36 = vmul.f32 1.442695, %v303_v27  ;;  %v305_v37 = vmul.f32 %v301_v28, %v245_v2 }
 0x220   :  { %v252_v16 = vadd.f32 1.0, %v248_v11  ;;  %v558_v21 = vadd.f32 %v721_v8, %v557_v15  ;;  %861 = vmatprep.mubr.msk.f32.mxu0 %vm585_vm1, %v566_v20  ;;  %v306_v40 = vmul.f32 1.442695, %v302_v30  ;;  %v304_v41 = vmul.f32 %v300_v31, %v244_v7 }
 0x221   :  { %946 = vrcp.f32 %v253_v13  ;;  %v569_v25 = vmax.f32 %v563_v19, 0.0  ;;  %862 = vmatmul.mubr.msk.f32.vlgmr.msra.gmra.mrb[8].mxu0 %vm585_vm1, %v567_v18  ;;  %v312_v49 = vmul.f32 1.442695, %v305_v37  ;;  %vm325_vm4 = vcmp.lt.f32.partialorder %v1229_v61, 0.0 }
 0x222   :  { %948 = vrcp.f32 %v252_v16  ;;  %v568_v24 = vmax.f32 %v558_v21, 0.0  ;;  %v310_v57 = vmul.f32 1.442695, %v304_v41  ;;  %vm324_vm5 = vcmp.lt.f32.partialorder %v1232_v63, 0.0 }
 0x223   :  { %950 = vpow2.f32 %v308_v36 }
 0x224   :  { %864 = vmatprep.mubr.msk.f32.mxu0 %vm585_vm1, %v568_v24  ;;  %952 = vpow2.f32 %v306_v40 }
 0x225   :  { %865 = vmatmul.mubr.msk.f32.gmra.mrb[10].mxu0 %vm585_vm1, %v569_v25  ;;  %954 = vpow2.f32 %v312_v49 }
 0x226   :  { %956 = vpow2.f32 %v310_v57 }
 0x227   :  { %v943_v26 = vpop.eup %942 }
 0x228   :  { %v945_v29 = vpop.eup %944  ;;  %v263_v32 = vmul.f32 1.0614054, %v943_v26 }
 0x229   :  { %v262_v33 = vmul.f32 1.0614054, %v945_v29 }
 0x22a   :  { %v267_v34 = vadd.f32 -1.4531521, %v263_v32 }
 0x22b   :  { %v947_v35 = vpop.eup %946  ;;  %v266_v38 = vadd.f32 -1.4531521, %v262_v33 }
 0x22c   :  { %v949_v39 = vpop.eup %948  ;;  %v271_v42 = vmul.f32 %v943_v26, %v267_v34  ;;  %v265_v43 = vmul.f32 1.0614054, %v947_v35 }
 0x22d   :  { %v270_v44 = vmul.f32 %v945_v29, %v266_v38  ;;  %v264_v45 = vmul.f32 1.0614054, %v949_v39  ;;  %v951_v18 = vpop.eup %950 }
 0x22e   :  { %v275_v46 = vadd.f32 1.4214138, %v271_v42  ;;  %v269_v47 = vadd.f32 -1.4531521, %v265_v43  ;;  %v953_v21 = vpop.eup %952  ;;  %v234_v43 = vmul.f32 0.5, %v1214_v50  ;;  %v237_v50 = vmul.f32 0.5, %v1223_v55 }
 0x22f   :  { %v274_v53 = vadd.f32 1.4214138, %v270_v44  ;;  %v268_v54 = vadd.f32 -1.4531521, %v264_v45  ;;  %v955_v30 = vpop.eup %954  ;;  %v684_v55 = vstv %s1292_s12 }
 0x230   :  { %v279_v58 = vmul.f32 %v943_v26, %v275_v46  ;;  %v273_v60 = vmul.f32 %v947_v35, %v269_v47  ;;  %v957_v33 = vpop.eup %956 }
 0x231   :  { %v278_v62 = vmul.f32 %v945_v29, %v274_v53  ;;  %v272_v1 = vmul.f32 %v949_v39, %v268_v54  ;;  %v236_v53 = vmul.f32 0.5, %v1226_v59  ;;  %v720_v59 = vld [vmem:[%s1287_s7] ss:$0 sm:$0xff]  ;;  %s982_s7 = smov [#allocation3]  }
 0x232   :  { %v283_v2 = vadd.f32 -0.28449672, %v279_v58  ;;  %v277_v4 = vadd.f32 1.4214138, %v273_v60 }
 0x233   :  { %v282_v6 = vadd.f32 -0.28449672, %v278_v62  ;;  %v276_v7 = vadd.f32 1.4214138, %v272_v1  ;;  %v726_v62 = vld [vmem:[%s1291_s11] ss:$0 sm:$0xff] }
 0x234   :  { %v287_v8 = vmul.f32 %v943_v26, %v283_v2  ;;  %v281_v9 = vmul.f32 %v947_v35, %v277_v4  ;;  %s702_s11 = sshll.u32 %s982_s7, 4  ;;  %s703_s11 = int_to_ptr.vmem [resolvable:$true] %s702_s11 }
 0x235   :  { %v286_v10 = vmul.f32 %v945_v29, %v282_v6  ;;  %v280_v11 = vmul.f32 %v949_v39, %v276_v7  ;;  %s958_s12 = scalar_lea.vmem %s703_s11, 512  ;;  %p963_p1 = scmp.lt.s32.totalorder %s703_s11, %s703_s11 }
 0x236   :  { %v291_v12 = vadd.f32 0.2548296, %v287_v8  ;;  %v285_v13 = vadd.f32 -0.28449672, %v281_v9  ;;  %p959_p0 = scmp.ne.s32.totalorder %s703_s11, %s958_s12  ;;  %p964_p2 = scmp.lt.s32.totalorder %s958_s12, %s958_s12 }
 0x237   :  { %v290_v14 = vadd.f32 0.2548296, %v286_v10  ;;  %v284_v15 = vadd.f32 -0.28449672, %v280_v11 }
 0x238   :  { %v295_v16 = vmul.f32 %v943_v26, %v291_v12  ;;  %v289_v17 = vmul.f32 %v947_v35, %v285_v13  ;;  %p965_p3 = por %p964_p2, %p963_p1 }
 0x239   :  { %v294_v19 = vmul.f32 %v945_v29, %v290_v14  ;;  %v288_v20 = vmul.f32 %v949_v39, %v284_v15 }
 0x23a   :  { %v315_v22 = vmul.f32 %v951_v18, %v295_v16  ;;  %v293_v23 = vadd.f32 0.2548296, %v289_v17  ;;  %p966_p4 = pnand %p965_p3, %p959_p0 }
 0x23b   :  { %v314_v24 = vmul.f32 %v953_v21, %v294_v19  ;;  %v292_v25 = vadd.f32 0.2548296, %v288_v20 }
 0x23c   :  { %v319_v27 = vsub.f32 1.0, %v315_v22  ;;  %v297_v28 = vmul.f32 %v947_v35, %v293_v23 }
 0x23d   :  { %v318_v31 = vsub.f32 1.0, %v314_v24  ;;  %v296_v32 = vmul.f32 %v949_v39, %v292_v25  ;;  %v235_v39 = vmul.f32 0.5, %v1212_v48 }
 0x23e   :  { %v327_v34 = vsub.f32 0.0, %v319_v27  ;;  %v317_v36 = vmul.f32 %v955_v30, %v297_v28 }
 0x23f   :  { %v326_v26 = vsub.f32 0.0, %v318_v31  ;;  %v316_v37 = vmul.f32 %v957_v33, %v296_v32 }
 0x240   :  { %v331_v29 = vsel %vm323_vm2, %v327_v34, %v319_v27  ;;  %v321_v38 = vsub.f32 1.0, %v317_v36 }
 0x241   :  { %v330_v40 = vsel %vm322_vm3, %v326_v26, %v318_v31  ;;  %v335_v41 = vadd.f32 1.0, %v331_v29  ;;  %v320_v42 = vsub.f32 1.0, %v316_v37 }
 0x242   :  { %v334_v35 = vadd.f32 1.0, %v330_v40  ;;  %v329_v44 = vsub.f32 0.0, %v321_v38 }
 0x243   :  { %v328_v45 = vsub.f32 0.0, %v320_v42  ;;  %v339_v47 = vmul.f32 %v335_v41, %v235_v39 }
 0x244   :  { %v338_v51 = vmul.f32 %v334_v35, %v234_v43  ;;  %v333_v46 = vsel %vm325_vm4, %v329_v44, %v321_v38 }
 0x245   :  { %v332_v52 = vsel %vm324_vm5, %v328_v45, %v320_v42  ;;  %v337_v49 = vadd.f32 1.0, %v333_v46 }
 0x246   :  { %825 = vmatprep.mubr.f32.mxu1 %v338_v51  ;;  %v336_v54 = vadd.f32 1.0, %v332_v52 }
 0x247   :  { %826 = vmatmul.mubr.f32.vlgmr.msra.gmra.mrb[0].mxu1 %v339_v47  ;;  %v341_v58 = vmul.f32 %v337_v49, %v237_v50 }
 0x248   :  { %v340_v57 = vmul.f32 %v336_v54, %v236_v53 }
 0x24a   :  { %828 = vmatprep.mubr.f32.mxu1 %v340_v57 }
 0x24b   :  { %829 = vmatmul.mubr.f32.gmra.mrb[2].mxu1 %v341_v58 }
 0x2f4   :  { %v863_v48 = vpop.f32.mrb[8].mxu0 }
 0x2f5   :  { %v664_v61 = vpop.f32.mrb[9].mxu0  ;;  %v670_v1 = vadd.f32 %v863_v48, %v726_v62 }
 0x2f6   :  { %v665_v2 = vadd.f32 %v726_v62, %v664_v61 }
 0x2f7   :  { %v686_v9 = vmul.f32 %v684_v55, %v670_v1 }
 0x2f8   :  { %v866_v60 = vpop.f32.mrb[10].mxu0  ;;  %v685_v12 = vmul.f32 %v684_v55, %v665_v2 }
 0x2f9   :  { %v674_v63 = vpop.f32.mrb[11].mxu0  ;;  %v680_v11 = vadd.f32 %v866_v60, %v726_v62 }
 0x2fa   :  { %v675_v14 = vadd.f32 %v726_v62, %v674_v63 }
 0x2fb   :  { %v688_v21 = vmul.f32 %v684_v55, %v680_v11 }
 0x31a   :  { %v827_v4 = vpop.f32.mrb[0].mxu1 }
 0x31b   :  { %v437_v6 = vadd.f32 %v827_v4, %v720_v59  ;;  %v431_v7 = vpop.f32.mrb[1].mxu1 }
 0x31c   :  { %v432_v8 = vadd.f32 %v720_v59, %v431_v7 }
 0x31d   :  { %v451_v10 = vadd.f32 %v437_v6, %v1109_v0  ;;  %v687_v0 = vmul.f32 %v684_v55, %v675_v14 }
 0x31e   :  { %v450_v13 = vadd.f32 %v432_v8, %v1099_v56  ;;  %v830_v15 = vpop.f32.mrb[2].mxu1 }
 0x31f   :  { %v690_v16 = vadd.f32 %v686_v9, %v451_v10  ;;  %v447_v17 = vadd.f32 %v830_v15, %v720_v59  ;;  %v441_v18 = vpop.f32.mrb[3].mxu1 }
 0x320   :  { %v689_v19 = vadd.f32 %v685_v12, %v450_v13  ;;  %v442_v20 = vadd.f32 %v720_v59, %v441_v18 }
 0x321   :  { %694 = vst.msk [vmem:[#allocation3 + $0x8] sm:$0xff] %vm52_vm0, %v690_v16  ;;  %v453_v22 = vadd.f32 %v447_v17, %v1117_v5 }
 0x322   :  { %693 = vst.msk [vmem:[#allocation3] sm:$0xff] %vm52_vm0, %v689_v19  ;;  %v452_v23 = vadd.f32 %v442_v20, %v1111_v3 }
 0x323   :  { %v692_v56 = vadd.f32 %v688_v21, %v453_v22 }
 0x324   :  { %v691_v24 = vadd.f32 %v687_v0, %v452_v23 }
 0x325   :  { %696 = vst.msk [vmem:[#allocation3 + $0x18] sm:$0xff] %vm52_vm0, %v692_v56 }
 0x326   :  { %695 = vst.msk [vmem:[#allocation3 + $0x10] sm:$0xff] %vm52_vm0, %v691_v24 }
 0x327   :  { %969 = shalt.err (!%p966_p4)
}
 0x328   :  { %s970_s29 = scalar_lea.hbm %s1293_s13, 512 }
 0x329   :  { %p971_p5 = scmp.ne.s32.totalorder %s1293_s13, %s970_s29  ;;  %p974_p6 = scmp.lt.u32.totalorder %s970_s29, %s1293_s13 }
 0x32b   :  { %p976_p7 = pnand %p974_p6, %p971_p5 }
 0x32d   :  { %979 = shalt.err (!%p976_p7)
}
 0x32e   :  { %s983_s2 = smov 128   ;;  %s984_s10 = smov 8  }
 0x32f   :  { %708 = dma.vmem_to_hbm [thread:$0]  %s703_s11, 512, %s1293_s13, [#allocation4], %s983_s2, %s983_s2, %s984_s10  }
 0x330   :  { %980 = dma.done.wait [#allocation4], 512  }
 0x331   :  { %981 = vsyncadd [#allocation4], 4294966784 }
 0x332   :  { %712 = vsyncpa [#allocation4], 1 }

</bundles_post_ra>
